<compile_context>
chip_gen: v5e
topology: v5e:2x2
jax: 0.10.0
libtpu: 0.0.40
codegen_flags: <defaults>
</compile_context>

<pallas_src>
import jax
import jax.numpy as jnp
import numpy as np
from jax.experimental import pallas as pl
from jax.experimental.pallas import tpu as pltpu

_LANE = 128
_SUBLANE = 8


def _round_up(x, m):
    return ((x + m - 1) // m) * m


def _gru_kernel(x_ref, wih_ref, whh_ref, bias_ref, bhhn_ref, out_ref, h_ref, gi_ref):
    """One (batch-tile, time-tile) block of a single-layer GRU.

    x_ref   : (T_tile, B_tile, F)        time-major input slab
    wih_ref : (3, F, H_pad)              per-gate input->hidden weights (r, z, n)
    whh_ref : (3, H_pad, H_pad)          per-gate hidden->hidden weights (r, z, n)
    bias_ref: (3, 1, H_pad)              [b_ih_r + b_hh_r, b_ih_z + b_hh_z, b_ih_n]
    bhhn_ref: (1, H_pad)                 b_hh_n (kept separate: it is scaled by r)
    out_ref : (T_tile, B_tile, H_pad)    hidden state for every step of the tile
    h_ref   : (B_tile, H_pad)            VMEM carry of h across time tiles
    gi_ref  : (3, T_tile*B_tile, H_pad)  VMEM scratch for the precomputed projection
    """
    t_tile, b_tile, f = x_ref.shape

    # New batch tile -> reset the recurrent carry (time axis is the last grid axis,
    # so all time tiles of a batch tile run in order before the next batch tile).
    @pl.when(pl.program_id(1) == 0)
    def _():
        h_ref[...] = jnp.zeros_like(h_ref)

    # ---- Time-parallel part: one MXU-friendly GEMM per gate for the whole tile ----
    x_flat = x_ref[...].reshape(t_tile * b_tile, f)
    for g in range(3):  # static unroll
        gi_ref[g] = (
            jnp.dot(x_flat, wih_ref[g], preferred_element_type=jnp.float32)
            + bias_ref[g]
        )

    whh_r = whh_ref[0]
    whh_z = whh_ref[1]
    whh_n = whh_ref[2]
    bhh_n = bhhn_ref[...]

    # ---- Sequential part: only h @ W_hh is truly recurrent ----
    h = h_ref[...]
    for tt in range(t_tile):  # static unroll; static sublane-aligned slices
        row = tt * b_tile
        gr = gi_ref[0, pl.ds(row, b_tile), :]
        gz = gi_ref[1, pl.ds(row, b_tile), :]
        gn = gi_ref[2, pl.ds(row, b_tile), :]
        r = jax.nn.sigmoid(gr + jnp.dot(h, whh_r, preferred_element_type=jnp.float32))
        z = jax.nn.sigmoid(gz + jnp.dot(h, whh_z, preferred_element_type=jnp.float32))
        n = jnp.tanh(gn + r * (jnp.dot(h, whh_n, preferred_element_type=jnp.float32)
                               + bhh_n))
        h = (1.0 - z) * n + z * h
        out_ref[tt] = h.astype(out_ref.dtype)
    h_ref[...] = h


def gru_forward_pallas(x_btf, w_ih, w_hh, b_ih, b_hh, *, t_tile=None):
    """Single-layer batch_first GRU forward (torch.nn.GRU semantics, h0 = 0).

    x_btf : (B, T, F) float32
    w_ih  : (3H, F)   PyTorch weight_ih_l0 (gate order r, z, n)
    w_hh  : (3H, H)   PyTorch weight_hh_l0
    b_ih  : (3H,)
    b_hh  : (3H,)
    returns rnn_out (B, T, H)
    """
    B, T, F = x_btf.shape
    H = w_hh.shape[1]

    # --- padding / tiling choices ---
    H_pad = _round_up(H, _LANE)              # lane-dense output & gate tiles
    B_pad = _round_up(B, _SUBLANE)           # full sublane occupancy
    if B_pad > 64:
        b_tile = 64
        B_pad = _round_up(B_pad, b_tile)
    else:
        b_tile = B_pad
    if t_tile is None:
        t_tile = min(T, 32)                  # amortize per-grid-step overhead
    T_pad = _round_up(T, t_tile)             # trailing padded steps are sliced off

    # --- per-gate, padded weight / bias layout ---
    # w_ih: (3H, F) -> (3, F, H_pad); w_hh: (3H, H) -> (3, H_pad, H_pad)
    wih_g = jnp.transpose(w_ih.reshape(3, H, F), (0, 2, 1))
    wih_g = jnp.pad(wih_g, ((0, 0), (0, 0), (0, H_pad - H)))
    whh_g = jnp.transpose(w_hh.reshape(3, H, H), (0, 2, 1))
    whh_g = jnp.pad(whh_g, ((0, 0), (0, H_pad - H), (0, H_pad - H)))

    bih_g = b_ih.reshape(3, 1, H)
    bhh_g = b_hh.reshape(3, 1, H)
    # Fold b_hh_r / b_hh_z into the precomputed projection; b_ih_n goes in too,
    # but b_hh_n must stay separate (it is multiplied by the reset gate).
    bias_g = jnp.concatenate([bih_g[0:2] + bhh_g[0:2], bih_g[2:3]], axis=0)
    bias_g = jnp.pad(bias_g, ((0, 0), (0, 0), (0, H_pad - H)))
    bhh_n = jnp.pad(bhh_g[2], ((0, 0), (0, H_pad - H)))          # (1, H_pad)

    # time-major, padded input
    x_tbf = jnp.transpose(x_btf, (1, 0, 2))                      # (T, B, F)
    x_tbf = jnp.pad(x_tbf, ((0, T_pad - T), (0, B_pad - B), (0, 0)))

    grid = (B_pad // b_tile, T_pad // t_tile)

    out_tbh = pl.pallas_call(
        _gru_kernel,
        out_shape=jax.ShapeDtypeStruct((T_pad, B_pad, H_pad), jnp.float32),
        grid=grid,
        in_specs=[
            pl.BlockSpec((t_tile, b_tile, F), lambda b, t: (t, b, 0)),
            pl.BlockSpec((3, F, H_pad), lambda b, t: (0, 0, 0)),
            pl.BlockSpec((3, H_pad, H_pad), lambda b, t: (0, 0, 0)),
            pl.BlockSpec((3, 1, H_pad), lambda b, t: (0, 0, 0)),
            pl.BlockSpec((1, H_pad), lambda b, t: (0, 0)),
        ],
        out_specs=pl.BlockSpec((t_tile, b_tile, H_pad), lambda b, t: (t, b, 0)),
        scratch_shapes=[
            pltpu.VMEM((b_tile, H_pad), jnp.float32),                 # h carry
            pltpu.VMEM((3, t_tile * b_tile, H_pad), jnp.float32),     # gi scratch
        ],
        compiler_params=pltpu.CompilerParams(
            # batch tiles are independent (megacore-shardable on v7x);
            # time recurrence must stay sequential.
            dimension_semantics=("parallel", "arbitrary"),
        ),
    )(x_tbf, wih_g, whh_g, bias_g, bhh_n)

    out_tbh = out_tbh[:T, :B, :H]                                # strip padding
    return jnp.transpose(out_tbh, (1, 0, 2))                     # (B, T, H)


def gru_forward_ref(x_btf, w_ih, w_hh, b_ih, b_hh):
    """Pure-JAX reference (lax.scan) matching torch.nn.GRU semantics."""
    B, T, F = x_btf.shape
    H = w_hh.shape[1]
    x_tbf = jnp.transpose(x_btf, (1, 0, 2))

    def step(h, x):
        gi = x @ w_ih.T + b_ih
        gh = h @ w_hh.T + b_hh
        gi_r, gi_z, gi_n = gi[:, :H], gi[:, H:2 * H], gi[:, 2 * H:]
        gh_r, gh_z, gh_n = gh[:, :H], gh[:, H:2 * H], gh[:, 2 * H:]
        r = jax.nn.sigmoid(gi_r + gh_r)
        z = jax.nn.sigmoid(gi_z + gh_z)
        n = jnp.tanh(gi_n + r * gh_n)
        h_new = (1.0 - z) * n + z * h
        return h_new, h_new

    h0 = jnp.zeros((B, H), jnp.float32)
    _, ys = jax.lax.scan(step, h0, x_tbf)
    return jnp.transpose(ys, (1, 0, 2))


class EncoderPallas:
    """Encoder(n_features, hidden_dim) with default GRU / 1 layer / no norm / no dropout."""

    def __init__(self, n_features, hidden_dim, key):
        self.n_features = n_features
        self.hidden_dim = hidden_dim
        k1, k2, k3, k4 = jax.random.split(key, 4)
        bound = 1.0 / np.sqrt(hidden_dim)
        # deterministic synthetic init, same shapes as torch.nn.GRU parameters
        self.w_ih = jax.random.uniform(k1, (3 * hidden_dim, n_features),
                                       jnp.float32, -bound, bound)
        self.w_hh = jax.random.uniform(k2, (3 * hidden_dim, hidden_dim),
                                       jnp.float32, -bound, bound)
        self.b_ih = jax.random.uniform(k3, (3 * hidden_dim,), jnp.float32, -bound, bound)
        self.b_hh = jax.random.uniform(k4, (3 * hidden_dim,), jnp.float32, -bound, bound)
        self.hidden = None
        self.cell_state = None  # stays None for GRU

    def forward(self, X):
        rnn_out = gru_forward_pallas(X, self.w_ih, self.w_hh, self.b_ih, self.b_hh)
        self.hidden = rnn_out[:, -1, :][None, ...]   # (1, B, H), like torch GRU h_n
        # TODO(synk): normalization / dropout / stacked-RNN branches are inactive
        # under the default constructor args and are not materialized here.
        return rnn_out, self.cell_state


if __name__ == "__main__":
    key = jax.random.PRNGKey(0)
    k_param, k_x = jax.random.split(key)

    batch, seq, n_features, hidden_dim = 4, 8, 8, 32
    enc = EncoderPallas(n_features, hidden_dim, k_param)

    X = jax.random.normal(k_x, (batch, seq, n_features), jnp.float32)

    rnn_out, cell_state = enc.forward(X)
    rnn_out = jax.block_until_ready(rnn_out)

    # correctness check against pure-JAX GRU reference
    ref = gru_forward_ref(X, enc.w_ih, enc.w_hh, enc.b_ih, enc.b_hh)
    np.testing.assert_allclose(np.asarray(rnn_out), np.asarray(ref),
                               rtol=1e-5, atol=2e-5)
    assert rnn_out.shape == (batch, seq, hidden_dim)
    assert cell_state is None

    print("KERNEL_OK")
</pallas_src>

<mosaic_0001>
module attributes {stable_mosaic.version = 11 : i64} {
  func.func @_gru_kernel(%arg0: i32, %arg1: i32, %arg2: memref<8x8x8xf32, #tpu.memory_space<vmem>>, %arg3: memref<3x8x128xf32, #tpu.memory_space<vmem>>, %arg4: memref<3x128x128xf32, #tpu.memory_space<vmem>>, %arg5: memref<3x1x128xf32, #tpu.memory_space<vmem>>, %arg6: memref<1x128xf32, #tpu.memory_space<vmem>>, %arg7: memref<8x8x128xf32, #tpu.memory_space<vmem>>, %arg8: memref<8x128xf32, #tpu.memory_space<vmem>>, %arg9: memref<3x64x128xf32, #tpu.memory_space<vmem>>) attributes {dimension_semantics = [#tpu.dimension_semantics<parallel>, #tpu.dimension_semantics<arbitrary>], iteration_bounds = array<i64: 1, 1>, scalar_prefetch = 0 : i64, scratch_operands = 2 : i64, tpu.core_type = #tpu.core_type<tc>, window_params = [{transform_indices = @transform_0, window_bounds = array<i64: 8, 8, 8>}, {pipeline_mode = #tpu.pipeline_mode<synchronous>, transform_indices = @transform_1, window_bounds = array<i64: 3, 8, 128>}, {pipeline_mode = #tpu.pipeline_mode<synchronous>, transform_indices = @transform_2, window_bounds = array<i64: 3, 128, 128>}, {pipeline_mode = #tpu.pipeline_mode<synchronous>, transform_indices = @transform_3, window_bounds = array<i64: 3, 1, 128>}, {pipeline_mode = #tpu.pipeline_mode<synchronous>, transform_indices = @transform_4, window_bounds = array<i64: 1, 128>}, {transform_indices = @transform_5, window_bounds = array<i64: 8, 8, 128>}]} {
    %c0_i32 = arith.constant 0 : i32
    %0 = arith.cmpi eq, %arg1, %c0_i32 : i32
    %1 = arith.extui %0 : i1 to i32
    %c0_i32_0 = arith.constant 0 : i32
    %2 = arith.cmpi ne, %1, %c0_i32_0 : i32
    scf.if %2 {
      %cst_177 = arith.constant 0.000000e+00 : f32
      %316 = vector.broadcast %cst_177 : f32 to vector<8x128xf32>
      %c0_178 = arith.constant 0 : index
      %c0_179 = arith.constant 0 : index
      %317 = vector.load %arg8[%c0_178, %c0_179] : memref<8x128xf32, #tpu.memory_space<vmem>>, vector<8x128xf32>
      tpu.vector_store %arg8[%c0_178, %c0_179], %316 {strides = array<i32>} : memref<8x128xf32, #tpu.memory_space<vmem>>, vector<8x128xf32>,
    } else {
    }
    %c0 = arith.constant 0 : index
    %c0_1 = arith.constant 0 : index
    %c0_2 = arith.constant 0 : index
    %3 = vector.load %arg2[%c0, %c0_1, %c0_2] : memref<8x8x8xf32, #tpu.memory_space<vmem>>, vector<8x8x8xf32>
    %4 = vector.shape_cast %3 : vector<8x8x8xf32> to vector<64x8xf32>
    %c0_3 = arith.constant 0 : index
    %c0_4 = arith.constant 0 : index
    %c0_5 = arith.constant 0 : index
    %5 = vector.load %arg3[%c0_3, %c0_4, %c0_5] : memref<3x8x128xf32, #tpu.memory_space<vmem>>, vector<1x8x128xf32>
    %6 = vector.shape_cast %5 : vector<1x8x128xf32> to vector<8x128xf32>
    %cst = arith.constant dense<0.000000e+00> : vector<64x128xf32>
    %7 = tpu.matmul %4, %6, %cst {dimension_numbers = #tpu.dot_dimension_numbers<[1], [0], [0], [1], [0, 0, 1, 1], [], []>} : vector<64x8xf32>, vector<8x128xf32>, vector<64x128xf32> -> vector<64x128xf32>
    %c0_6 = arith.constant 0 : index
    %c0_7 = arith.constant 0 : index
    %c0_8 = arith.constant 0 : index
    %8 = vector.load %arg5[%c0_6, %c0_7, %c0_8] : memref<3x1x128xf32, #tpu.memory_space<vmem>>, vector<1x1x128xf32>
    %9 = vector.shape_cast %8 : vector<1x1x128xf32> to vector<1x128xf32>
    %10 = vector.broadcast %9 : vector<1x128xf32> to vector<64x128xf32>
    %11 = arith.addf %7, %10 : vector<64x128xf32>
    %c0_9 = arith.constant 0 : index
    %c0_10 = arith.constant 0 : index
    %c0_11 = arith.constant 0 : index
    %12 = vector.load %arg9[%c0_9, %c0_10, %c0_11] : memref<3x64x128xf32, #tpu.memory_space<vmem>>, vector<1x64x128xf32>
    %13 = vector.shape_cast %12 : vector<1x64x128xf32> to vector<64x128xf32>
    %14 = vector.shape_cast %11 : vector<64x128xf32> to vector<1x64x128xf32>
    tpu.vector_store %arg9[%c0_9, %c0_10, %c0_11], %14 {strides = array<i32>} : memref<3x64x128xf32, #tpu.memory_space<vmem>>, vector<1x64x128xf32>,
    %c1 = arith.constant 1 : index
    %c0_12 = arith.constant 0 : index
    %c0_13 = arith.constant 0 : index
    %15 = vector.load %arg3[%c1, %c0_12, %c0_13] : memref<3x8x128xf32, #tpu.memory_space<vmem>>, vector<1x8x128xf32>
    %16 = vector.shape_cast %15 : vector<1x8x128xf32> to vector<8x128xf32>
    %cst_14 = arith.constant dense<0.000000e+00> : vector<64x128xf32>
    %17 = tpu.matmul %4, %16, %cst_14 {dimension_numbers = #tpu.dot_dimension_numbers<[1], [0], [0], [1], [0, 0, 1, 1], [], []>} : vector<64x8xf32>, vector<8x128xf32>, vector<64x128xf32> -> vector<64x128xf32>
    %c1_15 = arith.constant 1 : index
    %c0_16 = arith.constant 0 : index
    %c0_17 = arith.constant 0 : index
    %18 = vector.load %arg5[%c1_15, %c0_16, %c0_17] : memref<3x1x128xf32, #tpu.memory_space<vmem>>, vector<1x1x128xf32>
    %19 = vector.shape_cast %18 : vector<1x1x128xf32> to vector<1x128xf32>
    %20 = vector.broadcast %19 : vector<1x128xf32> to vector<64x128xf32>
    %21 = arith.addf %17, %20 : vector<64x128xf32>
    %c1_18 = arith.constant 1 : index
    %c0_19 = arith.constant 0 : index
    %c0_20 = arith.constant 0 : index
    %22 = vector.load %arg9[%c1_18, %c0_19, %c0_20] : memref<3x64x128xf32, #tpu.memory_space<vmem>>, vector<1x64x128xf32>
    %23 = vector.shape_cast %22 : vector<1x64x128xf32> to vector<64x128xf32>
    %24 = vector.shape_cast %21 : vector<64x128xf32> to vector<1x64x128xf32>
    tpu.vector_store %arg9[%c1_18, %c0_19, %c0_20], %24 {strides = array<i32>} : memref<3x64x128xf32, #tpu.memory_space<vmem>>, vector<1x64x128xf32>,
    %c2 = arith.constant 2 : index
    %c0_21 = arith.constant 0 : index
    %c0_22 = arith.constant 0 : index
    %25 = vector.load %arg3[%c2, %c0_21, %c0_22] : memref<3x8x128xf32, #tpu.memory_space<vmem>>, vector<1x8x128xf32>
    %26 = vector.shape_cast %25 : vector<1x8x128xf32> to vector<8x128xf32>
    %cst_23 = arith.constant dense<0.000000e+00> : vector<64x128xf32>
    %27 = tpu.matmul %4, %26, %cst_23 {dimension_numbers = #tpu.dot_dimension_numbers<[1], [0], [0], [1], [0, 0, 1, 1], [], []>} : vector<64x8xf32>, vector<8x128xf32>, vector<64x128xf32> -> vector<64x128xf32>
    %c2_24 = arith.constant 2 : index
    %c0_25 = arith.constant 0 : index
    %c0_26 = arith.constant 0 : index
    %28 = vector.load %arg5[%c2_24, %c0_25, %c0_26] : memref<3x1x128xf32, #tpu.memory_space<vmem>>, vector<1x1x128xf32>
    %29 = vector.shape_cast %28 : vector<1x1x128xf32> to vector<1x128xf32>
    %30 = vector.broadcast %29 : vector<1x128xf32> to vector<64x128xf32>
    %31 = arith.addf %27, %30 : vector<64x128xf32>
    %c2_27 = arith.constant 2 : index
    %c0_28 = arith.constant 0 : index
    %c0_29 = arith.constant 0 : index
    %32 = vector.load %arg9[%c2_27, %c0_28, %c0_29] : memref<3x64x128xf32, #tpu.memory_space<vmem>>, vector<1x64x128xf32>
    %33 = vector.shape_cast %32 : vector<1x64x128xf32> to vector<64x128xf32>
    %34 = vector.shape_cast %31 : vector<64x128xf32> to vector<1x64x128xf32>
    tpu.vector_store %arg9[%c2_27, %c0_28, %c0_29], %34 {strides = array<i32>} : memref<3x64x128xf32, #tpu.memory_space<vmem>>, vector<1x64x128xf32>,
    %c0_30 = arith.constant 0 : index
    %c0_31 = arith.constant 0 : index
    %c0_32 = arith.constant 0 : index
    %35 = vector.load %arg4[%c0_30, %c0_31, %c0_32] : memref<3x128x128xf32, #tpu.memory_space<vmem>>, vector<1x128x128xf32>
    %36 = vector.shape_cast %35 : vector<1x128x128xf32> to vector<128x128xf32>
    %c1_33 = arith.constant 1 : index
    %c0_34 = arith.constant 0 : index
    %c0_35 = arith.constant 0 : index
    %37 = vector.load %arg4[%c1_33, %c0_34, %c0_35] : memref<3x128x128xf32, #tpu.memory_space<vmem>>, vector<1x128x128xf32>
    %38 = vector.shape_cast %37 : vector<1x128x128xf32> to vector<128x128xf32>
    %c2_36 = arith.constant 2 : index
    %c0_37 = arith.constant 0 : index
    %c0_38 = arith.constant 0 : index
    %39 = vector.load %arg4[%c2_36, %c0_37, %c0_38] : memref<3x128x128xf32, #tpu.memory_space<vmem>>, vector<1x128x128xf32>
    %40 = vector.shape_cast %39 : vector<1x128x128xf32> to vector<128x128xf32>
    %c0_39 = arith.constant 0 : index
    %c0_40 = arith.constant 0 : index
    %41 = vector.load %arg6[%c0_39, %c0_40] : memref<1x128xf32, #tpu.memory_space<vmem>>, vector<1x128xf32>
    %c0_41 = arith.constant 0 : index
    %c0_42 = arith.constant 0 : index
    %42 = vector.load %arg8[%c0_41, %c0_42] : memref<8x128xf32, #tpu.memory_space<vmem>>, vector<8x128xf32>
    %c0_43 = arith.constant 0 : index
    %c0_44 = arith.constant 0 : index
    %c0_45 = arith.constant 0 : index
    %43 = vector.load %arg9[%c0_43, %c0_44, %c0_45] : memref<3x64x128xf32, #tpu.memory_space<vmem>>, vector<1x8x128xf32>
    %44 = vector.shape_cast %43 : vector<1x8x128xf32> to vector<8x128xf32>
    %c1_46 = arith.constant 1 : index
    %c0_47 = arith.constant 0 : index
    %c0_48 = arith.constant 0 : index
    %45 = vector.load %arg9[%c1_46, %c0_47, %c0_48] : memref<3x64x128xf32, #tpu.memory_space<vmem>>, vector<1x8x128xf32>
    %46 = vector.shape_cast %45 : vector<1x8x128xf32> to vector<8x128xf32>
    %c2_49 = arith.constant 2 : index
    %c0_50 = arith.constant 0 : index
    %c0_51 = arith.constant 0 : index
    %47 = vector.load %arg9[%c2_49, %c0_50, %c0_51] : memref<3x64x128xf32, #tpu.memory_space<vmem>>, vector<1x8x128xf32>
    %48 = vector.shape_cast %47 : vector<1x8x128xf32> to vector<8x128xf32>
    %cst_52 = arith.constant dense<0.000000e+00> : vector<8x128xf32>
    %49 = tpu.matmul %42, %36, %cst_52 {dimension_numbers = #tpu.dot_dimension_numbers<[1], [0], [0], [1], [0, 0, 1, 1], [], []>} : vector<8x128xf32>, vector<128x128xf32>, vector<8x128xf32> -> vector<8x128xf32>
    %50 = arith.addf %44, %49 : vector<8x128xf32>
    %51 = arith.negf %50 : vector<8x128xf32>
    %52 = math.exp %51 : vector<8x128xf32>
    %cst_53 = arith.constant 1.000000e+00 : f32
    %53 = vector.broadcast %cst_53 : f32 to vector<8x128xf32>
    %54 = arith.addf %53, %52 : vector<8x128xf32>
    %55 = arith.divf %53, %54 : vector<8x128xf32>
    %cst_54 = arith.constant dense<0.000000e+00> : vector<8x128xf32>
    %56 = tpu.matmul %42, %38, %cst_54 {dimension_numbers = #tpu.dot_dimension_numbers<[1], [0], [0], [1], [0, 0, 1, 1], [], []>} : vector<8x128xf32>, vector<128x128xf32>, vector<8x128xf32> -> vector<8x128xf32>
    %57 = arith.addf %46, %56 : vector<8x128xf32>
    %58 = arith.negf %57 : vector<8x128xf32>
    %59 = math.exp %58 : vector<8x128xf32>
    %cst_55 = arith.constant 1.000000e+00 : f32
    %60 = vector.broadcast %cst_55 : f32 to vector<8x128xf32>
    %61 = arith.addf %60, %59 : vector<8x128xf32>
    %62 = arith.divf %60, %61 : vector<8x128xf32>
    %cst_56 = arith.constant dense<0.000000e+00> : vector<8x128xf32>
    %63 = tpu.matmul %42, %40, %cst_56 {dimension_numbers = #tpu.dot_dimension_numbers<[1], [0], [0], [1], [0, 0, 1, 1], [], []>} : vector<8x128xf32>, vector<128x128xf32>, vector<8x128xf32> -> vector<8x128xf32>
    %64 = vector.broadcast %41 : vector<1x128xf32> to vector<8x128xf32>
    %65 = arith.addf %63, %64 : vector<8x128xf32>
    %66 = arith.mulf %55, %65 : vector<8x128xf32>
    %67 = arith.addf %48, %66 : vector<8x128xf32>
    %68 = math.tanh %67 : vector<8x128xf32>
    %cst_57 = arith.constant 1.000000e+00 : f32
    %69 = vector.broadcast %cst_57 : f32 to vector<8x128xf32>
    %70 = arith.subf %69, %62 : vector<8x128xf32>
    %71 = arith.mulf %70, %68 : vector<8x128xf32>
    %72 = arith.mulf %62, %42 : vector<8x128xf32>
    %73 = arith.addf %71, %72 : vector<8x128xf32>
    %c0_58 = arith.constant 0 : index
    %c0_59 = arith.constant 0 : index
    %c0_60 = arith.constant 0 : index
    %74 = vector.load %arg7[%c0_58, %c0_59, %c0_60] : memref<8x8x128xf32, #tpu.memory_space<vmem>>, vector<1x8x128xf32>
    %75 = vector.shape_cast %74 : vector<1x8x128xf32> to vector<8x128xf32>
    %76 = vector.shape_cast %73 : vector<8x128xf32> to vector<1x8x128xf32>
    tpu.vector_store %arg7[%c0_58, %c0_59, %c0_60], %76 {strides = array<i32>} : memref<8x8x128xf32, #tpu.memory_space<vmem>>, vector<1x8x128xf32>,
    %c0_61 = arith.constant 0 : index
    %c8 = arith.constant 8 : index
    %c0_62 = arith.constant 0 : index
    %77 = vector.load %arg9[%c0_61, %c8, %c0_62] : memref<3x64x128xf32, #tpu.memory_space<vmem>>, vector<1x8x128xf32>
    %78 = vector.shape_cast %77 : vector<1x8x128xf32> to vector<8x128xf32>
    %c1_63 = arith.constant 1 : index
    %c8_64 = arith.constant 8 : index
    %c0_65 = arith.constant 0 : index
    %79 = vector.load %arg9[%c1_63, %c8_64, %c0_65] : memref<3x64x128xf32, #tpu.memory_space<vmem>>, vector<1x8x128xf32>
    %80 = vector.shape_cast %79 : vector<1x8x128xf32> to vector<8x128xf32>
    %c2_66 = arith.constant 2 : index
    %c8_67 = arith.constant 8 : index
    %c0_68 = arith.constant 0 : index
    %81 = vector.load %arg9[%c2_66, %c8_67, %c0_68] : memref<3x64x128xf32, #tpu.memory_space<vmem>>, vector<1x8x128xf32>
    %82 = vector.shape_cast %81 : vector<1x8x128xf32> to vector<8x128xf32>
    %cst_69 = arith.constant dense<0.000000e+00> : vector<8x128xf32>
    %83 = tpu.matmul %73, %36, %cst_69 {dimension_numbers = #tpu.dot_dimension_numbers<[1], [0], [0], [1], [0, 0, 1, 1], [], []>} : vector<8x128xf32>, vector<128x128xf32>, vector<8x128xf32> -> vector<8x128xf32>
    %84 = arith.addf %78, %83 : vector<8x128xf32>
    %85 = arith.negf %84 : vector<8x128xf32>
    %86 = math.exp %85 : vector<8x128xf32>
    %cst_70 = arith.constant 1.000000e+00 : f32
    %87 = vector.broadcast %cst_70 : f32 to vector<8x128xf32>
    %88 = arith.addf %87, %86 : vector<8x128xf32>
    %89 = arith.divf %87, %88 : vector<8x128xf32>
    %cst_71 = arith.constant dense<0.000000e+00> : vector<8x128xf32>
    %90 = tpu.matmul %73, %38, %cst_71 {dimension_numbers = #tpu.dot_dimension_numbers<[1], [0], [0], [1], [0, 0, 1, 1], [], []>} : vector<8x128xf32>, vector<128x128xf32>, vector<8x128xf32> -> vector<8x128xf32>
    %91 = arith.addf %80, %90 : vector<8x128xf32>
    %92 = arith.negf %91 : vector<8x128xf32>
    %93 = math.exp %92 : vector<8x128xf32>
    %cst_72 = arith.constant 1.000000e+00 : f32
    %94 = vector.broadcast %cst_72 : f32 to vector<8x128xf32>
    %95 = arith.addf %94, %93 : vector<8x128xf32>
    %96 = arith.divf %94, %95 : vector<8x128xf32>
    %cst_73 = arith.constant dense<0.000000e+00> : vector<8x128xf32>
    %97 = tpu.matmul %73, %40, %cst_73 {dimension_numbers = #tpu.dot_dimension_numbers<[1], [0], [0], [1], [0, 0, 1, 1], [], []>} : vector<8x128xf32>, vector<128x128xf32>, vector<8x128xf32> -> vector<8x128xf32>
    %98 = vector.broadcast %41 : vector<1x128xf32> to vector<8x128xf32>
    %99 = arith.addf %97, %98 : vector<8x128xf32>
    %100 = arith.mulf %89, %99 : vector<8x128xf32>
    %101 = arith.addf %82, %100 : vector<8x128xf32>
    %102 = math.tanh %101 : vector<8x128xf32>
    %cst_74 = arith.constant 1.000000e+00 : f32
    %103 = vector.broadcast %cst_74 : f32 to vector<8x128xf32>
    %104 = arith.subf %103, %96 : vector<8x128xf32>
    %105 = arith.mulf %104, %102 : vector<8x128xf32>
    %106 = arith.mulf %96, %73 : vector<8x128xf32>
    %107 = arith.addf %105, %106 : vector<8x128xf32>
    %c1_75 = arith.constant 1 : index
    %c0_76 = arith.constant 0 : index
    %c0_77 = arith.constant 0 : index
    %108 = vector.load %arg7[%c1_75, %c0_76, %c0_77] : memref<8x8x128xf32, #tpu.memory_space<vmem>>, vector<1x8x128xf32>
    %109 = vector.shape_cast %108 : vector<1x8x128xf32> to vector<8x128xf32>
    %110 = vector.shape_cast %107 : vector<8x128xf32> to vector<1x8x128xf32>
    tpu.vector_store %arg7[%c1_75, %c0_76, %c0_77], %110 {strides = array<i32>} : memref<8x8x128xf32, #tpu.memory_space<vmem>>, vector<1x8x128xf32>,
    %c0_78 = arith.constant 0 : index
    %c16 = arith.constant 16 : index
    %c0_79 = arith.constant 0 : index
    %111 = vector.load %arg9[%c0_78, %c16, %c0_79] : memref<3x64x128xf32, #tpu.memory_space<vmem>>, vector<1x8x128xf32>
    %112 = vector.shape_cast %111 : vector<1x8x128xf32> to vector<8x128xf32>
    %c1_80 = arith.constant 1 : index
    %c16_81 = arith.constant 16 : index
    %c0_82 = arith.constant 0 : index
    %113 = vector.load %arg9[%c1_80, %c16_81, %c0_82] : memref<3x64x128xf32, #tpu.memory_space<vmem>>, vector<1x8x128xf32>
    %114 = vector.shape_cast %113 : vector<1x8x128xf32> to vector<8x128xf32>
    %c2_83 = arith.constant 2 : index
    %c16_84 = arith.constant 16 : index
    %c0_85 = arith.constant 0 : index
    %115 = vector.load %arg9[%c2_83, %c16_84, %c0_85] : memref<3x64x128xf32, #tpu.memory_space<vmem>>, vector<1x8x128xf32>
    %116 = vector.shape_cast %115 : vector<1x8x128xf32> to vector<8x128xf32>
    %cst_86 = arith.constant dense<0.000000e+00> : vector<8x128xf32>
    %117 = tpu.matmul %107, %36, %cst_86 {dimension_numbers = #tpu.dot_dimension_numbers<[1], [0], [0], [1], [0, 0, 1, 1], [], []>} : vector<8x128xf32>, vector<128x128xf32>, vector<8x128xf32> -> vector<8x128xf32>
    %118 = arith.addf %112, %117 : vector<8x128xf32>
    %119 = arith.negf %118 : vector<8x128xf32>
    %120 = math.exp %119 : vector<8x128xf32>
    %cst_87 = arith.constant 1.000000e+00 : f32
    %121 = vector.broadcast %cst_87 : f32 to vector<8x128xf32>
    %122 = arith.addf %121, %120 : vector<8x128xf32>
    %123 = arith.divf %121, %122 : vector<8x128xf32>
    %cst_88 = arith.constant dense<0.000000e+00> : vector<8x128xf32>
    %124 = tpu.matmul %107, %38, %cst_88 {dimension_numbers = #tpu.dot_dimension_numbers<[1], [0], [0], [1], [0, 0, 1, 1], [], []>} : vector<8x128xf32>, vector<128x128xf32>, vector<8x128xf32> -> vector<8x128xf32>
    %125 = arith.addf %114, %124 : vector<8x128xf32>
    %126 = arith.negf %125 : vector<8x128xf32>
    %127 = math.exp %126 : vector<8x128xf32>
    %cst_89 = arith.constant 1.000000e+00 : f32
    %128 = vector.broadcast %cst_89 : f32 to vector<8x128xf32>
    %129 = arith.addf %128, %127 : vector<8x128xf32>
    %130 = arith.divf %128, %129 : vector<8x128xf32>
    %cst_90 = arith.constant dense<0.000000e+00> : vector<8x128xf32>
    %131 = tpu.matmul %107, %40, %cst_90 {dimension_numbers = #tpu.dot_dimension_numbers<[1], [0], [0], [1], [0, 0, 1, 1], [], []>} : vector<8x128xf32>, vector<128x128xf32>, vector<8x128xf32> -> vector<8x128xf32>
    %132 = vector.broadcast %41 : vector<1x128xf32> to vector<8x128xf32>
    %133 = arith.addf %131, %132 : vector<8x128xf32>
    %134 = arith.mulf %123, %133 : vector<8x128xf32>
    %135 = arith.addf %116, %134 : vector<8x128xf32>
    %136 = math.tanh %135 : vector<8x128xf32>
    %cst_91 = arith.constant 1.000000e+00 : f32
    %137 = vector.broadcast %cst_91 : f32 to vector<8x128xf32>
    %138 = arith.subf %137, %130 : vector<8x128xf32>
    %139 = arith.mulf %138, %136 : vector<8x128xf32>
    %140 = arith.mulf %130, %107 : vector<8x128xf32>
    %141 = arith.addf %139, %140 : vector<8x128xf32>
    %c2_92 = arith.constant 2 : index
    %c0_93 = arith.constant 0 : index
    %c0_94 = arith.constant 0 : index
    %142 = vector.load %arg7[%c2_92, %c0_93, %c0_94] : memref<8x8x128xf32, #tpu.memory_space<vmem>>, vector<1x8x128xf32>
    %143 = vector.shape_cast %142 : vector<1x8x128xf32> to vector<8x128xf32>
    %144 = vector.shape_cast %141 : vector<8x128xf32> to vector<1x8x128xf32>
    tpu.vector_store %arg7[%c2_92, %c0_93, %c0_94], %144 {strides = array<i32>} : memref<8x8x128xf32, #tpu.memory_space<vmem>>, vector<1x8x128xf32>,
    %c0_95 = arith.constant 0 : index
    %c24 = arith.constant 24 : index
    %c0_96 = arith.constant 0 : index
    %145 = vector.load %arg9[%c0_95, %c24, %c0_96] : memref<3x64x128xf32, #tpu.memory_space<vmem>>, vector<1x8x128xf32>
    %146 = vector.shape_cast %145 : vector<1x8x128xf32> to vector<8x128xf32>
    %c1_97 = arith.constant 1 : index
    %c24_98 = arith.constant 24 : index
    %c0_99 = arith.constant 0 : index
    %147 = vector.load %arg9[%c1_97, %c24_98, %c0_99] : memref<3x64x128xf32, #tpu.memory_space<vmem>>, vector<1x8x128xf32>
    %148 = vector.shape_cast %147 : vector<1x8x128xf32> to vector<8x128xf32>
    %c2_100 = arith.constant 2 : index
    %c24_101 = arith.constant 24 : index
    %c0_102 = arith.constant 0 : index
    %149 = vector.load %arg9[%c2_100, %c24_101, %c0_102] : memref<3x64x128xf32, #tpu.memory_space<vmem>>, vector<1x8x128xf32>
    %150 = vector.shape_cast %149 : vector<1x8x128xf32> to vector<8x128xf32>
    %cst_103 = arith.constant dense<0.000000e+00> : vector<8x128xf32>
    %151 = tpu.matmul %141, %36, %cst_103 {dimension_numbers = #tpu.dot_dimension_numbers<[1], [0], [0], [1], [0, 0, 1, 1], [], []>} : vector<8x128xf32>, vector<128x128xf32>, vector<8x128xf32> -> vector<8x128xf32>
    %152 = arith.addf %146, %151 : vector<8x128xf32>
    %153 = arith.negf %152 : vector<8x128xf32>
    %154 = math.exp %153 : vector<8x128xf32>
    %cst_104 = arith.constant 1.000000e+00 : f32
    %155 = vector.broadcast %cst_104 : f32 to vector<8x128xf32>
    %156 = arith.addf %155, %154 : vector<8x128xf32>
    %157 = arith.divf %155, %156 : vector<8x128xf32>
    %cst_105 = arith.constant dense<0.000000e+00> : vector<8x128xf32>
    %158 = tpu.matmul %141, %38, %cst_105 {dimension_numbers = #tpu.dot_dimension_numbers<[1], [0], [0], [1], [0, 0, 1, 1], [], []>} : vector<8x128xf32>, vector<128x128xf32>, vector<8x128xf32> -> vector<8x128xf32>
    %159 = arith.addf %148, %158 : vector<8x128xf32>
    %160 = arith.negf %159 : vector<8x128xf32>
    %161 = math.exp %160 : vector<8x128xf32>
    %cst_106 = arith.constant 1.000000e+00 : f32
    %162 = vector.broadcast %cst_106 : f32 to vector<8x128xf32>
    %163 = arith.addf %162, %161 : vector<8x128xf32>
    %164 = arith.divf %162, %163 : vector<8x128xf32>
    %cst_107 = arith.constant dense<0.000000e+00> : vector<8x128xf32>
    %165 = tpu.matmul %141, %40, %cst_107 {dimension_numbers = #tpu.dot_dimension_numbers<[1], [0], [0], [1], [0, 0, 1, 1], [], []>} : vector<8x128xf32>, vector<128x128xf32>, vector<8x128xf32> -> vector<8x128xf32>
    %166 = vector.broadcast %41 : vector<1x128xf32> to vector<8x128xf32>
    %167 = arith.addf %165, %166 : vector<8x128xf32>
    %168 = arith.mulf %157, %167 : vector<8x128xf32>
    %169 = arith.addf %150, %168 : vector<8x128xf32>
    %170 = math.tanh %169 : vector<8x128xf32>
    %cst_108 = arith.constant 1.000000e+00 : f32
    %171 = vector.broadcast %cst_108 : f32 to vector<8x128xf32>
    %172 = arith.subf %171, %164 : vector<8x128xf32>
    %173 = arith.mulf %172, %170 : vector<8x128xf32>
    %174 = arith.mulf %164, %141 : vector<8x128xf32>
    %175 = arith.addf %173, %174 : vector<8x128xf32>
    %c3 = arith.constant 3 : index
    %c0_109 = arith.constant 0 : index
    %c0_110 = arith.constant 0 : index
    %176 = vector.load %arg7[%c3, %c0_109, %c0_110] : memref<8x8x128xf32, #tpu.memory_space<vmem>>, vector<1x8x128xf32>
    %177 = vector.shape_cast %176 : vector<1x8x128xf32> to vector<8x128xf32>
    %178 = vector.shape_cast %175 : vector<8x128xf32> to vector<1x8x128xf32>
    tpu.vector_store %arg7[%c3, %c0_109, %c0_110], %178 {strides = array<i32>} : memref<8x8x128xf32, #tpu.memory_space<vmem>>, vector<1x8x128xf32>,
    %c0_111 = arith.constant 0 : index
    %c32 = arith.constant 32 : index
    %c0_112 = arith.constant 0 : index
    %179 = vector.load %arg9[%c0_111, %c32, %c0_112] : memref<3x64x128xf32, #tpu.memory_space<vmem>>, vector<1x8x128xf32>
    %180 = vector.shape_cast %179 : vector<1x8x128xf32> to vector<8x128xf32>
    %c1_113 = arith.constant 1 : index
    %c32_114 = arith.constant 32 : index
    %c0_115 = arith.constant 0 : index
    %181 = vector.load %arg9[%c1_113, %c32_114, %c0_115] : memref<3x64x128xf32, #tpu.memory_space<vmem>>, vector<1x8x128xf32>
    %182 = vector.shape_cast %181 : vector<1x8x128xf32> to vector<8x128xf32>
    %c2_116 = arith.constant 2 : index
    %c32_117 = arith.constant 32 : index
    %c0_118 = arith.constant 0 : index
    %183 = vector.load %arg9[%c2_116, %c32_117, %c0_118] : memref<3x64x128xf32, #tpu.memory_space<vmem>>, vector<1x8x128xf32>
    %184 = vector.shape_cast %183 : vector<1x8x128xf32> to vector<8x128xf32>
    %cst_119 = arith.constant dense<0.000000e+00> : vector<8x128xf32>
    %185 = tpu.matmul %175, %36, %cst_119 {dimension_numbers = #tpu.dot_dimension_numbers<[1], [0], [0], [1], [0, 0, 1, 1], [], []>} : vector<8x128xf32>, vector<128x128xf32>, vector<8x128xf32> -> vector<8x128xf32>
    %186 = arith.addf %180, %185 : vector<8x128xf32>
    %187 = arith.negf %186 : vector<8x128xf32>
    %188 = math.exp %187 : vector<8x128xf32>
    %cst_120 = arith.constant 1.000000e+00 : f32
    %189 = vector.broadcast %cst_120 : f32 to vector<8x128xf32>
    %190 = arith.addf %189, %188 : vector<8x128xf32>
    %191 = arith.divf %189, %190 : vector<8x128xf32>
    %cst_121 = arith.constant dense<0.000000e+00> : vector<8x128xf32>
    %192 = tpu.matmul %175, %38, %cst_121 {dimension_numbers = #tpu.dot_dimension_numbers<[1], [0], [0], [1], [0, 0, 1, 1], [], []>} : vector<8x128xf32>, vector<128x128xf32>, vector<8x128xf32> -> vector<8x128xf32>
    %193 = arith.addf %182, %192 : vector<8x128xf32>
    %194 = arith.negf %193 : vector<8x128xf32>
    %195 = math.exp %194 : vector<8x128xf32>
    %cst_122 = arith.constant 1.000000e+00 : f32
    %196 = vector.broadcast %cst_122 : f32 to vector<8x128xf32>
    %197 = arith.addf %196, %195 : vector<8x128xf32>
    %198 = arith.divf %196, %197 : vector<8x128xf32>
    %cst_123 = arith.constant dense<0.000000e+00> : vector<8x128xf32>
    %199 = tpu.matmul %175, %40, %cst_123 {dimension_numbers = #tpu.dot_dimension_numbers<[1], [0], [0], [1], [0, 0, 1, 1], [], []>} : vector<8x128xf32>, vector<128x128xf32>, vector<8x128xf32> -> vector<8x128xf32>
    %200 = vector.broadcast %41 : vector<1x128xf32> to vector<8x128xf32>
    %201 = arith.addf %199, %200 : vector<8x128xf32>
    %202 = arith.mulf %191, %201 : vector<8x128xf32>
    %203 = arith.addf %184, %202 : vector<8x128xf32>
    %204 = math.tanh %203 : vector<8x128xf32>
    %cst_124 = arith.constant 1.000000e+00 : f32
    %205 = vector.broadcast %cst_124 : f32 to vector<8x128xf32>
    %206 = arith.subf %205, %198 : vector<8x128xf32>
    %207 = arith.mulf %206, %204 : vector<8x128xf32>
    %208 = arith.mulf %198, %175 : vector<8x128xf32>
    %209 = arith.addf %207, %208 : vector<8x128xf32>
    %c4 = arith.constant 4 : index
    %c0_125 = arith.constant 0 : index
    %c0_126 = arith.constant 0 : index
    %210 = vector.load %arg7[%c4, %c0_125, %c0_126] : memref<8x8x128xf32, #tpu.memory_space<vmem>>, vector<1x8x128xf32>
    %211 = vector.shape_cast %210 : vector<1x8x128xf32> to vector<8x128xf32>
    %212 = vector.shape_cast %209 : vector<8x128xf32> to vector<1x8x128xf32>
    tpu.vector_store %arg7[%c4, %c0_125, %c0_126], %212 {strides = array<i32>} : memref<8x8x128xf32, #tpu.memory_space<vmem>>, vector<1x8x128xf32>,
    %c0_127 = arith.constant 0 : index
    %c40 = arith.constant 40 : index
    %c0_128 = arith.constant 0 : index
    %213 = vector.load %arg9[%c0_127, %c40, %c0_128] : memref<3x64x128xf32, #tpu.memory_space<vmem>>, vector<1x8x128xf32>
    %214 = vector.shape_cast %213 : vector<1x8x128xf32> to vector<8x128xf32>
    %c1_129 = arith.constant 1 : index
    %c40_130 = arith.constant 40 : index
    %c0_131 = arith.constant 0 : index
    %215 = vector.load %arg9[%c1_129, %c40_130, %c0_131] : memref<3x64x128xf32, #tpu.memory_space<vmem>>, vector<1x8x128xf32>
    %216 = vector.shape_cast %215 : vector<1x8x128xf32> to vector<8x128xf32>
    %c2_132 = arith.constant 2 : index
    %c40_133 = arith.constant 40 : index
    %c0_134 = arith.constant 0 : index
    %217 = vector.load %arg9[%c2_132, %c40_133, %c0_134] : memref<3x64x128xf32, #tpu.memory_space<vmem>>, vector<1x8x128xf32>
    %218 = vector.shape_cast %217 : vector<1x8x128xf32> to vector<8x128xf32>
    %cst_135 = arith.constant dense<0.000000e+00> : vector<8x128xf32>
    %219 = tpu.matmul %209, %36, %cst_135 {dimension_numbers = #tpu.dot_dimension_numbers<[1], [0], [0], [1], [0, 0, 1, 1], [], []>} : vector<8x128xf32>, vector<128x128xf32>, vector<8x128xf32> -> vector<8x128xf32>
    %220 = arith.addf %214, %219 : vector<8x128xf32>
    %221 = arith.negf %220 : vector<8x128xf32>
    %222 = math.exp %221 : vector<8x128xf32>
    %cst_136 = arith.constant 1.000000e+00 : f32
    %223 = vector.broadcast %cst_136 : f32 to vector<8x128xf32>
    %224 = arith.addf %223, %222 : vector<8x128xf32>
    %225 = arith.divf %223, %224 : vector<8x128xf32>
    %cst_137 = arith.constant dense<0.000000e+00> : vector<8x128xf32>
    %226 = tpu.matmul %209, %38, %cst_137 {dimension_numbers = #tpu.dot_dimension_numbers<[1], [0], [0], [1], [0, 0, 1, 1], [], []>} : vector<8x128xf32>, vector<128x128xf32>, vector<8x128xf32> -> vector<8x128xf32>
    %227 = arith.addf %216, %226 : vector<8x128xf32>
    %228 = arith.negf %227 : vector<8x128xf32>
    %229 = math.exp %228 : vector<8x128xf32>
    %cst_138 = arith.constant 1.000000e+00 : f32
    %230 = vector.broadcast %cst_138 : f32 to vector<8x128xf32>
    %231 = arith.addf %230, %229 : vector<8x128xf32>
    %232 = arith.divf %230, %231 : vector<8x128xf32>
    %cst_139 = arith.constant dense<0.000000e+00> : vector<8x128xf32>
    %233 = tpu.matmul %209, %40, %cst_139 {dimension_numbers = #tpu.dot_dimension_numbers<[1], [0], [0], [1], [0, 0, 1, 1], [], []>} : vector<8x128xf32>, vector<128x128xf32>, vector<8x128xf32> -> vector<8x128xf32>
    %234 = vector.broadcast %41 : vector<1x128xf32> to vector<8x128xf32>
    %235 = arith.addf %233, %234 : vector<8x128xf32>
    %236 = arith.mulf %225, %235 : vector<8x128xf32>
    %237 = arith.addf %218, %236 : vector<8x128xf32>
    %238 = math.tanh %237 : vector<8x128xf32>
    %cst_140 = arith.constant 1.000000e+00 : f32
    %239 = vector.broadcast %cst_140 : f32 to vector<8x128xf32>
    %240 = arith.subf %239, %232 : vector<8x128xf32>
    %241 = arith.mulf %240, %238 : vector<8x128xf32>
    %242 = arith.mulf %232, %209 : vector<8x128xf32>
    %243 = arith.addf %241, %242 : vector<8x128xf32>
    %c5 = arith.constant 5 : index
    %c0_141 = arith.constant 0 : index
    %c0_142 = arith.constant 0 : index
    %244 = vector.load %arg7[%c5, %c0_141, %c0_142] : memref<8x8x128xf32, #tpu.memory_space<vmem>>, vector<1x8x128xf32>
    %245 = vector.shape_cast %244 : vector<1x8x128xf32> to vector<8x128xf32>
    %246 = vector.shape_cast %243 : vector<8x128xf32> to vector<1x8x128xf32>
    tpu.vector_store %arg7[%c5, %c0_141, %c0_142], %246 {strides = array<i32>} : memref<8x8x128xf32, #tpu.memory_space<vmem>>, vector<1x8x128xf32>,
    %c0_143 = arith.constant 0 : index
    %c48 = arith.constant 48 : index
    %c0_144 = arith.constant 0 : index
    %247 = vector.load %arg9[%c0_143, %c48, %c0_144] : memref<3x64x128xf32, #tpu.memory_space<vmem>>, vector<1x8x128xf32>
    %248 = vector.shape_cast %247 : vector<1x8x128xf32> to vector<8x128xf32>
    %c1_145 = arith.constant 1 : index
    %c48_146 = arith.constant 48 : index
    %c0_147 = arith.constant 0 : index
    %249 = vector.load %arg9[%c1_145, %c48_146, %c0_147] : memref<3x64x128xf32, #tpu.memory_space<vmem>>, vector<1x8x128xf32>
    %250 = vector.shape_cast %249 : vector<1x8x128xf32> to vector<8x128xf32>
    %c2_148 = arith.constant 2 : index
    %c48_149 = arith.constant 48 : index
    %c0_150 = arith.constant 0 : index
    %251 = vector.load %arg9[%c2_148, %c48_149, %c0_150] : memref<3x64x128xf32, #tpu.memory_space<vmem>>, vector<1x8x128xf32>
    %252 = vector.shape_cast %251 : vector<1x8x128xf32> to vector<8x128xf32>
    %cst_151 = arith.constant dense<0.000000e+00> : vector<8x128xf32>
    %253 = tpu.matmul %243, %36, %cst_151 {dimension_numbers = #tpu.dot_dimension_numbers<[1], [0], [0], [1], [0, 0, 1, 1], [], []>} : vector<8x128xf32>, vector<128x128xf32>, vector<8x128xf32> -> vector<8x128xf32>
    %254 = arith.addf %248, %253 : vector<8x128xf32>
    %255 = arith.negf %254 : vector<8x128xf32>
    %256 = math.exp %255 : vector<8x128xf32>
    %cst_152 = arith.constant 1.000000e+00 : f32
    %257 = vector.broadcast %cst_152 : f32 to vector<8x128xf32>
    %258 = arith.addf %257, %256 : vector<8x128xf32>
    %259 = arith.divf %257, %258 : vector<8x128xf32>
    %cst_153 = arith.constant dense<0.000000e+00> : vector<8x128xf32>
    %260 = tpu.matmul %243, %38, %cst_153 {dimension_numbers = #tpu.dot_dimension_numbers<[1], [0], [0], [1], [0, 0, 1, 1], [], []>} : vector<8x128xf32>, vector<128x128xf32>, vector<8x128xf32> -> vector<8x128xf32>
    %261 = arith.addf %250, %260 : vector<8x128xf32>
    %262 = arith.negf %261 : vector<8x128xf32>
    %263 = math.exp %262 : vector<8x128xf32>
    %cst_154 = arith.constant 1.000000e+00 : f32
    %264 = vector.broadcast %cst_154 : f32 to vector<8x128xf32>
    %265 = arith.addf %264, %263 : vector<8x128xf32>
    %266 = arith.divf %264, %265 : vector<8x128xf32>
    %cst_155 = arith.constant dense<0.000000e+00> : vector<8x128xf32>
    %267 = tpu.matmul %243, %40, %cst_155 {dimension_numbers = #tpu.dot_dimension_numbers<[1], [0], [0], [1], [0, 0, 1, 1], [], []>} : vector<8x128xf32>, vector<128x128xf32>, vector<8x128xf32> -> vector<8x128xf32>
    %268 = vector.broadcast %41 : vector<1x128xf32> to vector<8x128xf32>
    %269 = arith.addf %267, %268 : vector<8x128xf32>
    %270 = arith.mulf %259, %269 : vector<8x128xf32>
    %271 = arith.addf %252, %270 : vector<8x128xf32>
    %272 = math.tanh %271 : vector<8x128xf32>
    %cst_156 = arith.constant 1.000000e+00 : f32
    %273 = vector.broadcast %cst_156 : f32 to vector<8x128xf32>
    %274 = arith.subf %273, %266 : vector<8x128xf32>
    %275 = arith.mulf %274, %272 : vector<8x128xf32>
    %276 = arith.mulf %266, %243 : vector<8x128xf32>
    %277 = arith.addf %275, %276 : vector<8x128xf32>
    %c6 = arith.constant 6 : index
    %c0_157 = arith.constant 0 : index
    %c0_158 = arith.constant 0 : index
    %278 = vector.load %arg7[%c6, %c0_157, %c0_158] : memref<8x8x128xf32, #tpu.memory_space<vmem>>, vector<1x8x128xf32>
    %279 = vector.shape_cast %278 : vector<1x8x128xf32> to vector<8x128xf32>
    %280 = vector.shape_cast %277 : vector<8x128xf32> to vector<1x8x128xf32>
    tpu.vector_store %arg7[%c6, %c0_157, %c0_158], %280 {strides = array<i32>} : memref<8x8x128xf32, #tpu.memory_space<vmem>>, vector<1x8x128xf32>,
    %c0_159 = arith.constant 0 : index
    %c56 = arith.constant 56 : index
    %c0_160 = arith.constant 0 : index
    %281 = vector.load %arg9[%c0_159, %c56, %c0_160] : memref<3x64x128xf32, #tpu.memory_space<vmem>>, vector<1x8x128xf32>
    %282 = vector.shape_cast %281 : vector<1x8x128xf32> to vector<8x128xf32>
    %c1_161 = arith.constant 1 : index
    %c56_162 = arith.constant 56 : index
    %c0_163 = arith.constant 0 : index
    %283 = vector.load %arg9[%c1_161, %c56_162, %c0_163] : memref<3x64x128xf32, #tpu.memory_space<vmem>>, vector<1x8x128xf32>
    %284 = vector.shape_cast %283 : vector<1x8x128xf32> to vector<8x128xf32>
    %c2_164 = arith.constant 2 : index
    %c56_165 = arith.constant 56 : index
    %c0_166 = arith.constant 0 : index
    %285 = vector.load %arg9[%c2_164, %c56_165, %c0_166] : memref<3x64x128xf32, #tpu.memory_space<vmem>>, vector<1x8x128xf32>
    %286 = vector.shape_cast %285 : vector<1x8x128xf32> to vector<8x128xf32>
    %cst_167 = arith.constant dense<0.000000e+00> : vector<8x128xf32>
    %287 = tpu.matmul %277, %36, %cst_167 {dimension_numbers = #tpu.dot_dimension_numbers<[1], [0], [0], [1], [0, 0, 1, 1], [], []>} : vector<8x128xf32>, vector<128x128xf32>, vector<8x128xf32> -> vector<8x128xf32>
    %288 = arith.addf %282, %287 : vector<8x128xf32>
    %289 = arith.negf %288 : vector<8x128xf32>
    %290 = math.exp %289 : vector<8x128xf32>
    %cst_168 = arith.constant 1.000000e+00 : f32
    %291 = vector.broadcast %cst_168 : f32 to vector<8x128xf32>
    %292 = arith.addf %291, %290 : vector<8x128xf32>
    %293 = arith.divf %291, %292 : vector<8x128xf32>
    %cst_169 = arith.constant dense<0.000000e+00> : vector<8x128xf32>
    %294 = tpu.matmul %277, %38, %cst_169 {dimension_numbers = #tpu.dot_dimension_numbers<[1], [0], [0], [1], [0, 0, 1, 1], [], []>} : vector<8x128xf32>, vector<128x128xf32>, vector<8x128xf32> -> vector<8x128xf32>
    %295 = arith.addf %284, %294 : vector<8x128xf32>
    %296 = arith.negf %295 : vector<8x128xf32>
    %297 = math.exp %296 : vector<8x128xf32>
    %cst_170 = arith.constant 1.000000e+00 : f32
    %298 = vector.broadcast %cst_170 : f32 to vector<8x128xf32>
    %299 = arith.addf %298, %297 : vector<8x128xf32>
    %300 = arith.divf %298, %299 : vector<8x128xf32>
    %cst_171 = arith.constant dense<0.000000e+00> : vector<8x128xf32>
    %301 = tpu.matmul %277, %40, %cst_171 {dimension_numbers = #tpu.dot_dimension_numbers<[1], [0], [0], [1], [0, 0, 1, 1], [], []>} : vector<8x128xf32>, vector<128x128xf32>, vector<8x128xf32> -> vector<8x128xf32>
    %302 = vector.broadcast %41 : vector<1x128xf32> to vector<8x128xf32>
    %303 = arith.addf %301, %302 : vector<8x128xf32>
    %304 = arith.mulf %293, %303 : vector<8x128xf32>
    %305 = arith.addf %286, %304 : vector<8x128xf32>
    %306 = math.tanh %305 : vector<8x128xf32>
    %cst_172 = arith.constant 1.000000e+00 : f32
    %307 = vector.broadcast %cst_172 : f32 to vector<8x128xf32>
    %308 = arith.subf %307, %300 : vector<8x128xf32>
    %309 = arith.mulf %308, %306 : vector<8x128xf32>
    %310 = arith.mulf %300, %277 : vector<8x128xf32>
    %311 = arith.addf %309, %310 : vector<8x128xf32>
    %c7 = arith.constant 7 : index
    %c0_173 = arith.constant 0 : index
    %c0_174 = arith.constant 0 : index
    %312 = vector.load %arg7[%c7, %c0_173, %c0_174] : memref<8x8x128xf32, #tpu.memory_space<vmem>>, vector<1x8x128xf32>
    %313 = vector.shape_cast %312 : vector<1x8x128xf32> to vector<8x128xf32>
    %314 = vector.shape_cast %311 : vector<8x128xf32> to vector<1x8x128xf32>
    tpu.vector_store %arg7[%c7, %c0_173, %c0_174], %314 {strides = array<i32>} : memref<8x8x128xf32, #tpu.memory_space<vmem>>, vector<1x8x128xf32>,
    %c0_175 = arith.constant 0 : index
    %c0_176 = arith.constant 0 : index
    %315 = vector.load %arg8[%c0_175, %c0_176] : memref<8x128xf32, #tpu.memory_space<vmem>>, vector<8x128xf32>
    tpu.vector_store %arg8[%c0_175, %c0_176], %311 {strides = array<i32>} : memref<8x128xf32, #tpu.memory_space<vmem>>, vector<8x128xf32>,
    return
  }
  func.func @transform_0(%arg0: i32, %arg1: i32) -> (i32, i32, i32) {
    %c0_i32 = arith.constant 0 : i32
    %c0_i32_0 = arith.constant 0 : i32
    return %arg1, %arg0, %c0_i32 : i32, i32, i32
  }
  func.func @transform_1(%arg0: i32, %arg1: i32) -> (i32, i32, i32) {
    %c0_i32 = arith.constant 0 : i32
    %c0_i32_0 = arith.constant 0 : i32
    %c0_i32_1 = arith.constant 0 : i32
    %c0_i32_2 = arith.constant 0 : i32
    return %c0_i32, %c0_i32_0, %c0_i32_1 : i32, i32, i32
  }
  func.func @transform_2(%arg0: i32, %arg1: i32) -> (i32, i32, i32) {
    %c0_i32 = arith.constant 0 : i32
    %c0_i32_0 = arith.constant 0 : i32
    %c0_i32_1 = arith.constant 0 : i32
    %c0_i32_2 = arith.constant 0 : i32
    return %c0_i32, %c0_i32_0, %c0_i32_1 : i32, i32, i32
  }
  func.func @transform_3(%arg0: i32, %arg1: i32) -> (i32, i32, i32) {
    %c0_i32 = arith.constant 0 : i32
    %c0_i32_0 = arith.constant 0 : i32
    %c0_i32_1 = arith.constant 0 : i32
    %c0_i32_2 = arith.constant 0 : i32
    return %c0_i32, %c0_i32_0, %c0_i32_1 : i32, i32, i32
  }
  func.func @transform_4(%arg0: i32, %arg1: i32) -> (i32, i32) {
    %c0_i32 = arith.constant 0 : i32
    %c0_i32_0 = arith.constant 0 : i32
    %c0_i32_1 = arith.constant 0 : i32
    return %c0_i32, %c0_i32_0 : i32, i32
  }
  func.func @transform_5(%arg0: i32, %arg1: i32) -> (i32, i32, i32) {
    %c0_i32 = arith.constant 0 : i32
    %c0_i32_0 = arith.constant 0 : i32
    return %arg1, %arg0, %c0_i32 : i32, i32, i32
  }
}

</mosaic_0001>

<bundles_post_ra>
// kernel: tpu_custom_call.1
= control target key start
LH: loop header
LB: loop body
LE: loop exit
PB: predicated region body
PF: predicated region fallthrough
CT: control target
= control target key end

     0   :  { %10 = vsyncpa [#allocation5], 0  ;;  %s2373_s0 = inlined_call_operand.hbm [shape: f32[8,8,8], index: 0, kind: input, shape index: {}]   ;;  %s2374_s1 = inlined_call_operand.hbm [shape: f32[3,8,128], index: 1, kind: input, shape index: {}]   ;;  %s2375_s2 = inlined_call_operand.hbm [shape: f32[3,128,128], index: 2, kind: input, shape index: {}]   ;;  %s2376_s3 = inlined_call_operand.hbm [shape: f32[3,1,128], index: 3, kind: input, shape index: {}]   ;;  %s2377_s4 = inlined_call_operand.vmem [shape: f32[1,128], index: 4, kind: input, shape index: {}]   ;;  %s2378_s5 = inlined_call_operand.hbm [shape: f32[8,8,128], index: 5, kind: output, shape index: {}]  }
   0x1   :  { %11 = vsyncpa [#allocation8], 0 }
   0x2   :  { %12 = vsyncpa [#allocation11], 0 }
   0x3   :  { %13 = vsyncpa [#allocation6], 0  ;;  %s31_s20 = sshll.u32 %s2374_s1, 4  ;;  %s1577_s21 = smov [#allocation7]   ;;  %s32_s20 = int_to_ptr.hbm [resolvable:$true] %s31_s20 }
   0x4   :  { %s33_s22 = sshll.u32 %s1577_s21, 4  ;;  %s18_s25 = sshll.u32 %s2373_s0, 4  ;;  %s34_s22 = int_to_ptr.vmem [resolvable:$true] %s33_s22  ;;  %s19_s25 = int_to_ptr.hbm [resolvable:$true] %s18_s25 }
   0x5   :  { %s1578_s26 = smov 128   ;;  %s1579_s27 = smov 8  }
   0x6   :  { %39 = dma.hbm_to_vmem [thread:$0]  %s32_s20, 384, %s34_s22, [#allocation8], %s1578_s26, %s1578_s26, %s1579_s27  }
   0x7   :  { %s1580_s28 = smov [#allocation4]   ;;  %s44_s1 = sshll.u32 %s2375_s2, 4  ;;  %s45_s1 = int_to_ptr.hbm [resolvable:$true] %s44_s1 }
   0x8   :  { %s20_s29 = sshll.u32 %s1580_s28, 4  ;;  %s57_s8 = sshll.u32 %s2376_s3, 4  ;;  %s21_s29 = int_to_ptr.vmem [resolvable:$true] %s20_s29  ;;  %s58_s8 = int_to_ptr.hbm [resolvable:$true] %s57_s8 }
   0x9   :  { %26 = dma.hbm_to_vmem [thread:$0]  %s19_s25, 1024, %s21_s29, [#allocation5], %s1578_s26, %s1578_s26, %s1579_s27  }
   0xa   :  { %s1581_s9 = smov [#allocation9]   ;;  %s1582_s11 = smov [#allocation10]  }
   0xb   :  { %s46_s10 = sshll.u32 %s1581_s9, 4  ;;  %s59_s2 = sshll.u32 %s1582_s11, 4  ;;  %s47_s10 = int_to_ptr.vmem [resolvable:$true] %s46_s10  ;;  %s60_s2 = int_to_ptr.vmem [resolvable:$true] %s59_s2 }
   0xc   :  { %52 = dma.hbm_to_vmem [thread:$0]  %s45_s1, 6144, %s47_s10, [#allocation8], %s1578_s26, %s1578_s26, %s1579_s27  }
   0xd   :  { %s1583_s12 = smov 16   ;;  %s1584_s13 = smov 1  }
   0xe   :  { %65 = dma.hbm_to_vmem [thread:$0]  %s58_s8, 48, %s60_s2, [#allocation11], %s1583_s12, %s1583_s12, %s1584_s13  }
   0xf   :  { %1569 = dma.done.wait [#allocation5], 1024  }
  0x10   :  { %1570 = vsyncadd [#allocation5], 4294966272 }
  0x11   :  { %1571 = dma.done.wait [#allocation8], 6528  }
  0x12   :  { %1572 = vsyncadd [#allocation8], 4294960768 }
  0x13   :  { %1573 = dma.done.wait [#allocation11], 48  }
  0x14   :  { %1574 = vsyncadd [#allocation11], 4294967248  ;;  %v1638_v0 = vld [vmem:[#allocation9 + $0x78] sm:$0xff]  ;;  %v1640_v1 = vld [vmem:[#allocation9 + $0x70] sm:$0xff]  ;;  %vm102_vm0 = vcmask 64512   ;;  %v1585_v39 = vmov 0.0  }
  0x15   :  { %345 = vmatpush.msra.mxu3 %v1638_v0  ;;  %v97_v2 = vld [vmem:[#allocation7] sm:$0xff]  ;;  %v1650_v5 = vld [vmem:[#allocation9 + $0x60] sm:$0xff]  ;;  %v1653_v6 = vld [vmem:[#allocation9 + $0x58] sm:$0xff]  ;;  %s1247_s20 = sshll.u32 %s2378_s5, 4  ;;  %s1248_s20 = int_to_ptr.hbm [resolvable:$true] %s1247_s20 }
  0x16   :  { %v1643_v3 = vld [vmem:[#allocation9 + $0x68] sm:$0xff]  ;;  %142 = vmatpush.msra.mxu0 %v97_v2  ;;  %1302 = vmatpush.msra.mxu2 %v97_v2  ;;  %v1656_v7 = vld [vmem:[#allocation9 + $0x178] sm:$0xff]  ;;  %v1658_v8 = vld [vmem:[#allocation9 + $0x50] sm:$0xff] }
  0x17   :  { %v1645_v4 = vld [vmem:[#allocation4] sm:$0xff]  ;;  %346 = vmatpush.msra.mxu3 %v1640_v1  ;;  %v1660_v9 = vld [vmem:[#allocation4 + $0x8] sm:$0xff]  ;;  %v1674_v13 = vld [vmem:[#allocation9 + $0x160] sm:$0xff] }
  0x18   :  { %1262 = vmatmul.msk.f32.vlgmr.msra.gmra.mxu0 %vm102_vm0, %v1645_v4  ;;  %v1663_v10 = vld [vmem:[#allocation9 + $0x170] sm:$0xff]  ;;  %v1666_v11 = vld [vmem:[#allocation9 + $0x168] sm:$0xff]  ;;  %v1676_v14 = vld [vmem:[#allocation9 + $0x40] sm:$0xff] }
  0x19   :  { %347 = vmatpush.msra.mxu3 %v1643_v3  ;;  %428 = vmatpush.msrb.mxu0 %v1656_v7  ;;  %v1668_v12 = vld [vmem:[#allocation9 + $0x48] sm:$0xff]  ;;  %v1680_v15 = vld [vmem:[#allocation9 + $0x158] sm:$0xff]  ;;  %v1682_v16 = vld [vmem:[#allocation4 + $0x38] sm:$0xff] }
  0x1a   :  { %v1684_v17 = vld [vmem:[#allocation9 + $0x38] sm:$0xff]  ;;  %1269 = vmatmul.msk.f32.vlgmr.msra.gmra.mxu2 %vm102_vm0, %v1682_v16  ;;  %v1690_v18 = vld [vmem:[#allocation9 + $0x150] sm:$0xff]  ;;  %v1698_v21 = vld [vmem:[#allocation9 + $0x148] sm:$0xff] }
  0x1b   :  { %348 = vmatpush.msra.mxu3 %v1650_v5  ;;  %429 = vmatpush.msrb.mxu0 %v1663_v10  ;;  %v1692_v19 = vld [vmem:[#allocation9 + $0x30] sm:$0xff]  ;;  %v1694_v20 = vld [vmem:[#allocation4 + $0x10] sm:$0xff]  ;;  %v1700_v22 = vld [vmem:[#allocation9 + $0x28] sm:$0xff] }
  0x1c   :  { %v1706_v23 = vld [vmem:[#allocation9 + $0x140] sm:$0xff]  ;;  %v1712_v25 = vld [vmem:[#allocation9 + $0x138] sm:$0xff]  ;;  %v177_v26 = vld [vmem:[#allocation7 + $0x8] sm:$0xff] }
  0x1d   :  { %349 = vmatpush.msra.mxu3 %v1653_v6  ;;  %430 = vmatpush.msrb.mxu0 %v1666_v11  ;;  %v1708_v24 = vld [vmem:[#allocation9 + $0x20] sm:$0xff]  ;;  %v1714_v27 = vld [vmem:[#allocation9 + $0x18] sm:$0xff]  ;;  %v1718_v28 = vld [vmem:[#allocation9 + $0x130] sm:$0xff] }
  0x1e   :  { %1303 = vmatpush.msrb.mxu2 %v177_v26  ;;  %v1722_v29 = vld [vmem:[#allocation9 + $0x10] sm:$0xff]  ;;  %v1724_v30 = vld [vmem:[#allocation4 + $0x18] sm:$0xff]  ;;  %198 = vmatpush.msra.mxu1 %v177_v26  ;;  %v1728_v31 = vld [vmem:[#allocation9 + $0x128] sm:$0xff] }
  0x1f   :  { %350 = vmatpush.msra.mxu3 %v1658_v8  ;;  %431 = vmatpush.msrb.mxu0 %v1674_v13  ;;  %2399 = vst [vmem:[#allocation17_spill] sm:$0xff] %v1722_v29  ;;  %v1732_v32 = vld [vmem:[#allocation9 + $0x8] sm:$0xff]  ;;  %v1739_v33 = vld [vmem:[#allocation9 + $0x120] sm:$0xff]  ;;  %v1746_v35 = vld [vmem:[#allocation9 + $0x118] sm:$0xff] }
  0x20   :  { %1263 = vmatmul.msk.f32.gmra.mxu0 %vm102_vm0, %v1660_v9  ;;  %1270 = vmatmul.msk.f32.vlgmr.msra.gmra.mxu1 %vm102_vm0, %v1645_v4  ;;  %2400 = vst [vmem:[#allocation18_spill] sm:$0xff] %v1732_v32  ;;  %v1741_v34 = vld [vmem:[#allocation9] sm:$0xff]  ;;  %v234_v36 = vld [vmem:[#allocation7 + $0x10] sm:$0xff]  ;;  %v1752_v38 = vld [vmem:[#allocation9 + $0x110] sm:$0xff] }
  0x21   :  { %351 = vmatpush.msra.mxu3 %v1668_v12  ;;  %432 = vmatpush.msrb.mxu0 %v1680_v15  ;;  %2401 = vst [vmem:[#allocation19_spill] sm:$0xff] %v1741_v34  ;;  %v1748_v37 = vld [vmem:[#allocation9 + $0xf8] sm:$0xff]  ;;  %v1757_v40 = vld [vmem:[#allocation9 + $0xf0] sm:$0xff]  ;;  %v1759_v41 = vld [vmem:[#allocation4 + $0x20] sm:$0xff] }
  0x22   :  { %1277 = vmatmul.msk.f32.vlgmr.msrb.gmra.mxu2 %vm102_vm0, %v1682_v16  ;;  %459 = vmatpush.msrb.mxu1 %v1638_v0  ;;  %2402 = vst [vmem:[#allocation20_spill] sm:$0xff] %v1752_v38  ;;  %v1763_v42 = vld [vmem:[#allocation9 + $0x108] sm:$0xff]  ;;  %v1773_v44 = vld [vmem:[#allocation9 + $0x100] sm:$0xff]  ;;  %v1782_v46 = vld [vmem:[#allocation9 + $0xd8] sm:$0xff] }
  0x23   :  { %352 = vmatpush.msra.mxu3 %v1676_v14  ;;  %433 = vmatpush.msrb.mxu0 %v1690_v18  ;;  %2403 = vst [vmem:[#allocation21_spill] sm:$0xff] %v1763_v42  ;;  %v1766_v43 = vld [vmem:[#allocation9 + $0xe8] sm:$0xff]  ;;  %v1775_v45 = vld [vmem:[#allocation9 + $0xe0] sm:$0xff]  ;;  %v1789_v47 = vld [vmem:[#allocation9 + $0xd0] sm:$0xff] }
  0x24   :  { %460 = vmatpush.msrb.mxu1 %v1640_v1  ;;  %255 = vmatpush.msra.mxu2 %v234_v36  ;;  %2404 = vst [vmem:[#allocation22_spill] sm:$0xff] %v1773_v44  ;;  %v1791_v48 = vld [vmem:[#allocation4 + $0x28] sm:$0xff]  ;;  %v1797_v49 = vld [vmem:[#allocation9 + $0xc8] sm:$0xff]  ;;  %v1804_v50 = vld [vmem:[#allocation9 + $0xc0] sm:$0xff] }
  0x25   :  { %353 = vmatpush.msra.mxu3 %v1684_v17  ;;  %434 = vmatpush.msrb.mxu0 %v1698_v21  ;;  %v1811_v51 = vld [vmem:[#allocation9 + $0xb8] sm:$0xff]  ;;  %v1818_v52 = vld [vmem:[#allocation9 + $0xb0] sm:$0xff]  ;;  %v1826_v54 = vld [vmem:[#allocation9 + $0xa8] sm:$0xff] }
  0x26   :  { %499 = vmatpush.msrb.mxu2 %v1748_v37  ;;  %461 = vmatpush.msrb.mxu1 %v1643_v3  ;;  %v1820_v53 = vld [vmem:[#allocation4 + $0x30] sm:$0xff]  ;;  %v1833_v55 = vld [vmem:[#allocation9 + $0xa0] sm:$0xff]  ;;  %v1847_v57 = vld [vmem:[#allocation9 + $0x90] sm:$0xff] }
  0x27   :  { %354 = vmatpush.msra.mxu3 %v1692_v19  ;;  %435 = vmatpush.msrb.mxu0 %v1706_v23  ;;  %v1840_v56 = vld [vmem:[#allocation9 + $0x98] sm:$0xff]  ;;  %2406 = vst [vmem:[#allocation24_spill] sm:$0xff] %v1847_v57  ;;  %v1853_v58 = vld [vmem:[#allocation9 + $0x88] sm:$0xff]  ;;  %v1859_v59 = vld [vmem:[#allocation9 + $0x80] sm:$0xff] }
  0x28   :  { %1264 = vmatmul.msk.f32.gmra.mxu0 %vm102_vm0, %v1694_v20  ;;  %500 = vmatpush.msrb.mxu2 %v1757_v40  ;;  %2405 = vst [vmem:[#allocation23_spill] sm:$0xff] %v1840_v56  ;;  %v1314_v61 = vld [vmem:[#allocation10] ss:$0 sm:$0xff] }
  0x29   :  { %355 = vmatpush.msra.mxu3 %v1700_v22  ;;  %436 = vmatpush.msrb.mxu0 %v1712_v25  ;;  %2407 = vst [vmem:[#allocation25_spill] sm:$0xff] %v1853_v58 }
  0x2a   :  { %1278 = vmatmul.msk.f32.vlgmr.msra.gmra.mxu2 %vm102_vm0, %v1645_v4  ;;  %1271 = vmatmul.msk.f32.gmra.mxu1 %vm102_vm0, %v1660_v9  ;;  %2408 = vst [vmem:[#allocation26_spill] sm:$0xff] %v1859_v59 }
  0x2b   :  { %356 = vmatpush.msra.mxu3 %v1708_v24  ;;  %437 = vmatpush.msrb.mxu0 %v1718_v28 }
  0x2c   :  { %501 = vmatpush.msrb.mxu2 %v1766_v43  ;;  %462 = vmatpush.msrb.mxu1 %v1650_v5 }
  0x2d   :  { %357 = vmatpush.msra.mxu3 %v1714_v27  ;;  %438 = vmatpush.msrb.mxu0 %v1728_v31 }
  0x2e   :  { %502 = vmatpush.msrb.mxu2 %v1775_v45  ;;  %463 = vmatpush.msrb.mxu1 %v1653_v6 }
  0x2f   :  { %358 = vmatpush.msra.mxu3 %v1722_v29  ;;  %439 = vmatpush.msrb.mxu0 %v1739_v33 }
  0x30   :  { %1265 = vmatmul.msk.f32.gmra.mxu0 %vm102_vm0, %v1724_v30  ;;  %503 = vmatpush.msrb.mxu2 %v1782_v46 }
  0x31   :  { %359 = vmatpush.msra.mxu3 %v1732_v32  ;;  %440 = vmatpush.msrb.mxu0 %v1746_v35 }
  0x32   :  { %1279 = vmatmul.msk.f32.gmra.mxu2 %vm102_vm0, %v1660_v9  ;;  %464 = vmatpush.msrb.mxu1 %v1658_v8 }
  0x33   :  { %360 = vmatpush.msra.mxu3 %v1741_v34  ;;  %441 = vmatpush.msrb.mxu0 %v1752_v38 }
  0x34   :  { %361 = vmatmul.f32.vlgmr.msra.gmra.mxu3 %v1585_v39  ;;  %504 = vmatpush.msrb.mxu2 %v1789_v47 }
  0x35   :  { %385 = vmatpush.msrb.mxu3 %v1748_v37  ;;  %442 = vmatpush.msrb.mxu0 %v1763_v42 }
  0x36   :  { %1272 = vmatmul.msk.f32.gmra.mxu1 %vm102_vm0, %v1694_v20  ;;  %505 = vmatpush.msrb.mxu2 %v1797_v49 }
  0x37   :  { %386 = vmatpush.msrb.mxu3 %v1757_v40  ;;  %443 = vmatpush.msrb.mxu0 %v1773_v44 }
  0x38   :  { %1266 = vmatmul.msk.f32.gmra.mxu0 %vm102_vm0, %v1759_v41  ;;  %465 = vmatpush.msrb.mxu1 %v1668_v12 }
  0x39   :  { %387 = vmatpush.msrb.mxu3 %v1766_v43  ;;  %571 = vmatpush.msra.mxu0 %v1638_v0 }
  0x3a   :  { %1280 = vmatmul.msk.f32.gmra.mxu2 %vm102_vm0, %v1694_v20  ;;  %466 = vmatpush.msrb.mxu1 %v1676_v14 }
  0x3b   :  { %388 = vmatpush.msrb.mxu3 %v1775_v45  ;;  %506 = vmatpush.msrb.mxu2 %v1804_v50 }
  0x3c   :  { %572 = vmatpush.msra.mxu0 %v1640_v1  ;;  %467 = vmatpush.msrb.mxu1 %v1684_v17 }
  0x3d   :  { %389 = vmatpush.msrb.mxu3 %v1782_v46  ;;  %507 = vmatpush.msrb.mxu2 %v1811_v51 }
  0x3e   :  { %468 = vmatpush.msrb.mxu1 %v1692_v19  ;;  %573 = vmatpush.msra.mxu0 %v1643_v3 }
  0x3f   :  { %390 = vmatpush.msrb.mxu3 %v1789_v47  ;;  %508 = vmatpush.msrb.mxu2 %v1818_v52 }
  0x40   :  { %1267 = vmatmul.msk.f32.gmra.mxu0 %vm102_vm0, %v1791_v48  ;;  %1273 = vmatmul.msk.f32.gmra.mxu1 %vm102_vm0, %v1724_v30 }
  0x41   :  { %391 = vmatpush.msrb.mxu3 %v1797_v49  ;;  %469 = vmatpush.msrb.mxu1 %v1700_v22 }
  0x42   :  { %509 = vmatpush.msrb.mxu2 %v1826_v54  ;;  %574 = vmatpush.msra.mxu0 %v1650_v5 }
  0x43   :  { %392 = vmatpush.msrb.mxu3 %v1804_v50  ;;  %1281 = vmatmul.msk.f32.gmra.mxu2 %vm102_vm0, %v1724_v30 }
  0x44   :  { %470 = vmatpush.msrb.mxu1 %v1708_v24  ;;  %510 = vmatpush.msrb.mxu2 %v1833_v55 }
  0x45   :  { %393 = vmatpush.msrb.mxu3 %v1811_v51  ;;  %575 = vmatpush.msra.mxu0 %v1653_v6 }
  0x46   :  { %471 = vmatpush.msrb.mxu1 %v1714_v27  ;;  %511 = vmatpush.msrb.mxu2 %v1840_v56 }
  0x47   :  { %394 = vmatpush.msrb.mxu3 %v1818_v52  ;;  %576 = vmatpush.msra.mxu0 %v1658_v8 }
  0x48   :  { %1268 = vmatmul.msk.f32.gmra.mxu0 %vm102_vm0, %v1820_v53  ;;  %472 = vmatpush.msrb.mxu1 %v1722_v29 }
  0x49   :  { %395 = vmatpush.msrb.mxu3 %v1826_v54  ;;  %512 = vmatpush.msrb.mxu2 %v1847_v57 }
  0x4a   :  { %1274 = vmatmul.msk.f32.gmra.mxu1 %vm102_vm0, %v1759_v41  ;;  %577 = vmatpush.msra.mxu0 %v1668_v12 }
  0x4b   :  { %396 = vmatpush.msrb.mxu3 %v1833_v55  ;;  %473 = vmatpush.msrb.mxu1 %v1732_v32 }
  0x4c   :  { %513 = vmatpush.msrb.mxu2 %v1853_v58  ;;  %578 = vmatpush.msra.mxu0 %v1676_v14 }
  0x4d   :  { %397 = vmatpush.msrb.mxu3 %v1840_v56  ;;  %1282 = vmatmul.msk.f32.gmra.mxu2 %vm102_vm0, %v1759_v41 }
  0x4e   :  { %474 = vmatpush.msrb.mxu1 %v1741_v34  ;;  %514 = vmatpush.msrb.mxu2 %v1859_v59 }
  0x4f   :  { %398 = vmatpush.msrb.mxu3 %v1847_v57  ;;  %579 = vmatpush.msra.mxu0 %v1684_v17 }
  0x50   :  { %444 = vmatmul.f32.vlgmr.msrb.gmra.mxu0 %v1585_v39  ;;  %611 = vmatpush.msra.mxu1 %v1748_v37 }
  0x51   :  { %399 = vmatpush.msrb.mxu3 %v1853_v58  ;;  %651 = vmatpush.msra.mxu2 %v1656_v7 }
  0x52   :  { %612 = vmatpush.msra.mxu1 %v1757_v40  ;;  %580 = vmatpush.msra.mxu0 %v1692_v19 }
  0x53   :  { %400 = vmatpush.msrb.mxu3 %v1859_v59  ;;  %652 = vmatpush.msra.mxu2 %v1663_v10 }
  0x54   :  { %401 = vmatmul.f32.vlgmr.msrb.gmra.mxu3 %v1585_v39  ;;  %1275 = vmatmul.msk.f32.gmra.mxu1 %vm102_vm0, %v1791_v48 }
  0x55   :  { %539 = vmatpush.msra.mxu3 %v1656_v7  ;;  %613 = vmatpush.msra.mxu1 %v1766_v43 }
  0x56   :  { %653 = vmatpush.msra.mxu2 %v1666_v11  ;;  %581 = vmatpush.msra.mxu0 %v1700_v22 }
  0x57   :  { %540 = vmatpush.msra.mxu3 %v1663_v10  ;;  %1283 = vmatmul.msk.f32.gmra.mxu2 %vm102_vm0, %v1791_v48 }
  0x58   :  { %614 = vmatpush.msra.mxu1 %v1775_v45  ;;  %654 = vmatpush.msra.mxu2 %v1674_v13 }
  0x59   :  { %541 = vmatpush.msra.mxu3 %v1666_v11  ;;  %582 = vmatpush.msra.mxu0 %v1708_v24 }
  0x5a   :  { %615 = vmatpush.msra.mxu1 %v1782_v46  ;;  %655 = vmatpush.msra.mxu2 %v1680_v15 }
  0x5b   :  { %542 = vmatpush.msra.mxu3 %v1674_v13  ;;  %583 = vmatpush.msra.mxu0 %v1714_v27 }
  0x5c   :  { %616 = vmatpush.msra.mxu1 %v1789_v47  ;;  %656 = vmatpush.msra.mxu2 %v1690_v18 }
  0x5d   :  { %543 = vmatpush.msra.mxu3 %v1680_v15  ;;  %1276 = vmatmul.msk.f32.gmra.mxu1 %vm102_vm0, %v1820_v53 }
  0x5e   :  { %617 = vmatpush.msra.mxu1 %v1797_v49  ;;  %657 = vmatpush.msra.mxu2 %v1698_v21 }
  0x5f   :  { %544 = vmatpush.msra.mxu3 %v1690_v18  ;;  %1284 = vmatmul.msk.f32.gmra.mxu2 %vm102_vm0, %v1820_v53 }
  0x60   :  { %618 = vmatpush.msra.mxu1 %v1804_v50  ;;  %658 = vmatpush.msra.mxu2 %v1706_v23 }
  0x61   :  { %545 = vmatpush.msra.mxu3 %v1698_v21  ;;  %584 = vmatpush.msra.mxu0 %v1722_v29 }
  0x62   :  { %619 = vmatpush.msra.mxu1 %v1811_v51  ;;  %659 = vmatpush.msra.mxu2 %v1712_v25 }
  0x63   :  { %546 = vmatpush.msra.mxu3 %v1706_v23  ;;  %585 = vmatpush.msra.mxu0 %v1732_v32 }
  0x64   :  { %620 = vmatpush.msra.mxu1 %v1818_v52  ;;  %660 = vmatpush.msra.mxu2 %v1718_v28 }
  0x65   :  { %547 = vmatpush.msra.mxu3 %v1712_v25  ;;  %586 = vmatpush.msra.mxu0 %v1741_v34 }
  0x66   :  { %621 = vmatpush.msra.mxu1 %v1826_v54  ;;  %661 = vmatpush.msra.mxu2 %v1728_v31 }
  0x67   :  { %548 = vmatpush.msra.mxu3 %v1718_v28  ;;  %1285 = vmatmul.msk.f32.gmra.mxu2 %vm102_vm0, %v1682_v16 }
  0x68   :  { %622 = vmatpush.msra.mxu1 %v1833_v55  ;;  %662 = vmatpush.msra.mxu2 %v1739_v33 }
  0x69   :  { %549 = vmatpush.msra.mxu3 %v1728_v31  ;;  %723 = vmatpush.msrb.mxu0 %v1748_v37 }
  0x6a   :  { %623 = vmatpush.msra.mxu1 %v1840_v56  ;;  %663 = vmatpush.msra.mxu2 %v1746_v35 }
  0x6b   :  { %550 = vmatpush.msra.mxu3 %v1739_v33  ;;  %724 = vmatpush.msrb.mxu0 %v1757_v40 }
  0x6c   :  { %624 = vmatpush.msra.mxu1 %v1847_v57  ;;  %664 = vmatpush.msra.mxu2 %v1752_v38 }
  0x6d   :  { %551 = vmatpush.msra.mxu3 %v1746_v35  ;;  %725 = vmatpush.msrb.mxu0 %v1766_v43 }
  0x6e   :  { %625 = vmatpush.msra.mxu1 %v1853_v58  ;;  %665 = vmatpush.msra.mxu2 %v1763_v42 }
  0x6f   :  { %552 = vmatpush.msra.mxu3 %v1752_v38  ;;  %726 = vmatpush.msrb.mxu0 %v1775_v45 }
  0x70   :  { %626 = vmatpush.msra.mxu1 %v1859_v59  ;;  %666 = vmatpush.msra.mxu2 %v1773_v44 }
  0x71   :  { %553 = vmatpush.msra.mxu3 %v1763_v42  ;;  %727 = vmatpush.msrb.mxu0 %v1782_v46 }
  0x73   :  { %554 = vmatpush.msra.mxu3 %v1773_v44  ;;  %728 = vmatpush.msrb.mxu0 %v1789_v47 }
  0x75   :  { %683 = vmatpush.msrb.mxu3 %v1638_v0  ;;  %729 = vmatpush.msrb.mxu0 %v1797_v49 }
  0x77   :  { %684 = vmatpush.msrb.mxu3 %v1640_v1  ;;  %730 = vmatpush.msrb.mxu0 %v1804_v50 }
  0x79   :  { %685 = vmatpush.msrb.mxu3 %v1643_v3  ;;  %731 = vmatpush.msrb.mxu0 %v1811_v51 }
  0x7b   :  { %686 = vmatpush.msrb.mxu3 %v1650_v5  ;;  %732 = vmatpush.msrb.mxu0 %v1818_v52 }
  0x7d   :  { %687 = vmatpush.msrb.mxu3 %v1653_v6  ;;  %733 = vmatpush.msrb.mxu0 %v1826_v54 }
  0x7f   :  { %688 = vmatpush.msrb.mxu3 %v1658_v8  ;;  %734 = vmatpush.msrb.mxu0 %v1833_v55 }
  0x81   :  { %689 = vmatpush.msrb.mxu3 %v1668_v12  ;;  %735 = vmatpush.msrb.mxu0 %v1840_v56 }
  0x83   :  { %690 = vmatpush.msrb.mxu3 %v1676_v14  ;;  %736 = vmatpush.msrb.mxu0 %v1847_v57 }
  0x85   :  { %691 = vmatpush.msrb.mxu3 %v1684_v17  ;;  %737 = vmatpush.msrb.mxu0 %v1853_v58 }
  0x87   :  { %692 = vmatpush.msrb.mxu3 %v1692_v19  ;;  %738 = vmatpush.msrb.mxu0 %v1859_v59 }
  0x89   :  { %693 = vmatpush.msrb.mxu3 %v1700_v22 }
  0x8b   :  { %694 = vmatpush.msrb.mxu3 %v1708_v24 }
  0x8d   :  { %695 = vmatpush.msrb.mxu3 %v1714_v27 }
  0x8f   :  { %696 = vmatpush.msrb.mxu3 %v1722_v29 }
  0x91   :  { %697 = vmatpush.msrb.mxu3 %v1732_v32 }
  0x93   :  { %698 = vmatpush.msrb.mxu3 %v1741_v34 }
  0x95   :  { %v144_v60 = vpop.f32.mrf.mxu0 }
  0x96   :  { %v145_v39 = vadd.f32 %v1314_v61, %v144_v60 }
  0x9d   :  { %v147_v62 = vpop.f32.mrf.mxu0  ;;  %v165_v9 = vpop.f32.mrf.mxu2 }
  0x9e   :  { %v1977_v63 = vadd.f32 %v1314_v61, %v147_v62  ;;  %v1981_v16 = vadd.f32 %v1314_v61, %v165_v9 }
  0xa0   :  { %2409 = vst [vmem:[#allocation27_spill] sm:$0xff] %v1977_v63 }
  0xa1   :  { %2411 = vst [vmem:[#allocation29_spill] sm:$0xff] %v1981_v16 }
  0xa5   :  { %v150_v2 = vpop.f32.mrf.mxu0 }
  0xa6   :  { %v1979_v4 = vadd.f32 %v1314_v61, %v150_v2 }
  0xa8   :  { %2410 = vst [vmem:[#allocation28_spill] sm:$0xff] %v1979_v4 }
  0xad   :  { %v153_v20 = vpop.f32.mrf.mxu0 }
  0xae   :  { %v1983_v26 = vadd.f32 %v1314_v61, %v153_v20  ;;  %v1991_v20 = vld [vmem:[#allocation10 + $0x1] ss:$0 sm:$0xff] }
  0xaf   :  { %2416 = vst [vmem:[#allocation34_spill] sm:$0xff] %v1991_v20 }
  0xb0   :  { %2412 = vst [vmem:[#allocation30_spill] sm:$0xff] %v1983_v26  ;;  %v200_v26 = vpop.f32.mrf.mxu1 }
  0xb1   :  { %v201_v60 = vadd.f32 %v1991_v20, %v200_v26 }
  0xb5   :  { %v156_v30 = vpop.f32.mrf.mxu0 }
  0xb6   :  { %v1985_v36 = vadd.f32 %v1314_v61, %v156_v30 }
  0xb7   :  { %v362_v41 = vpop.f32.mrf.mxu3 }
  0xb8   :  { %2413 = vst [vmem:[#allocation31_spill] sm:$0xff] %v1985_v36  ;;  %v365_v48 = vadd.f32 %v362_v41, %v145_v39 }
  0xba   :  { %v1286_v53 = vmul.f32 -1.442695, %v365_v48 }
  0xbc   :  { %1318 = vpow2.f32 %v1286_v53 }
  0xbd   :  { %v159_v59 = vpop.f32.mrf.mxu0 }
  0xbe   :  { %v1987_v62 = vadd.f32 %v1314_v61, %v159_v59  ;;  %v1994_v59 = vpop.f32.mrf.mxu2 }
  0xbf   :  { %2417 = vst [vmem:[#allocation35_spill] sm:$0xff] %v1994_v59 }
  0xc0   :  { %2414 = vst [vmem:[#allocation32_spill] sm:$0xff] %v1987_v62 }
  0xc2   :  { %v1319_v63 = vpop.eup %1318 }
  0xc3   :  { %v369_v9 = vadd.f32 1.0, %v1319_v63 }
  0xc5   :  { %v162_v2 = vpop.f32.mrf.mxu0  ;;  %1320 = vrcp.f32 %v369_v9  ;;  %vm375_vm2 = vweird.f32 %v369_v9  ;;  %v379_v63 = vand.u32 2147483647, %v369_v9 }
  0xc6   :  { %v1989_v4 = vadd.f32 %v1314_v61, %v162_v2  ;;  %v381_v61 = vand.u32 2147483648, %v369_v9  ;;  %v1999_v2 = vld [vmem:[%s2377_s4] ss:$0 sm:$0xff] }
  0xc7   :  { %vm380_vm4 = vcmp.eq.f32.partialorder %v379_v63, 8.507059e+37 }
  0xc8   :  { %2415 = vst [vmem:[#allocation33_spill] sm:$0xff] %v1989_v4 }
  0xcb   :  { %v1321_v16 = vpop.eup %1320 }
  0xcc   :  { %v371_v30 = vmul.f32 %v1321_v16, %v369_v9  ;;  %vm376_vm1 = vweird.f32 %v1321_v16 }
  0xcd   :  { %vm377_vm3 = vmor %vm375_vm2, %vm376_vm1  ;;  %v445_v26 = vpop.f32.mrf.mxu0 }
  0xce   :  { %v372_v36 = vsub.f32 1.0, %v371_v30 }
  0xd0   :  { %v373_v53 = vmul.f32 %v1321_v16, %v372_v36  ;;  %v446_v36 = vadd.f32 %v1999_v2, %v445_v26 }
  0xd2   :  { %v374_v62 = vadd.f32 %v1321_v16, %v373_v53  ;;  %v257_v53 = vpop.f32.mrf.mxu2 }
  0xd4   :  { %v378_v30 = vsel %vm377_vm3, %v1321_v16, %v374_v62 }
  0xd7   :  { %v402_v39 = vpop.f32.mrf.mxu3 }
  0xd8   :  { %v405_v41 = vadd.f32 %v402_v39, %v201_v60  ;;  %v382_v39 = vor.u32 1.1754944e-38, %v381_v61 }
  0xda   :  { %v1287_v48 = vmul.f32 -1.442695, %v405_v41  ;;  %v2002_v41 = vld [vmem:[#allocation10 + $0x2] ss:$0 sm:$0xff] }
  0xdb   :  { %v258_v59 = vadd.f32 %v2002_v41, %v257_v53 }
  0xdc   :  { %1322 = vpow2.f32 %v1287_v48  ;;  %v383_v48 = vsel %vm380_vm4, %v382_v39, %v378_v30 }
  0xdd   :  { %v448_v9 = vmul.f32 %v446_v36, %v383_v48 }
  0xdf   :  { %v449_v44 = vadd.f32 %v448_v9, %v258_v59  ;;  %v260_v59 = vpop.f32.mrf.mxu2 }
  0xe2   :  { %v1323_v4 = vpop.eup %1322 }
  0xe3   :  { %v409_v60 = vadd.f32 1.0, %v1323_v4 }
  0xe5   :  { %1324 = vrcp.f32 %v409_v60  ;;  %v421_v32 = vand.u32 2147483648, %v409_v60  ;;  %v419_v4 = vand.u32 2147483647, %v409_v60  ;;  %vm415_vm6 = vweird.f32 %v409_v60 }
  0xe6   :  { %1326 = vtanh.f32 %v449_v44  ;;  %v2421_v44 = vld [vmem:[#allocation22_spill] sm:$0xff] }
  0xe7   :  { %v422_v62 = vor.u32 1.1754944e-38, %v421_v32  ;;  %vm420_vm8 = vcmp.eq.f32.partialorder %v419_v4, 8.507059e+37  ;;  %v2418_v32 = vld [vmem:[#allocation21_spill] sm:$0xff]  ;;  %v2059_v53 = vpop.f32.mrf.mxu2 }
  0xe8   :  { %2424 = vst [vmem:[#allocation36_spill] sm:$0xff] %v2059_v53 }
  0xeb   :  { %v1325_v20 = vpop.eup %1324 }
  0xec   :  { %v411_v34 = vmul.f32 %v1325_v20, %v409_v60  ;;  %vm416_vm5 = vweird.f32 %v1325_v20  ;;  %v1327_v30 = vpop.eup %1326  ;;  %v203_v60 = vpop.f32.mrf.mxu1 }
  0xed   :  { %vm417_vm7 = vmor %vm415_vm6, %vm416_vm5 }
  0xee   :  { %v412_v58 = vsub.f32 1.0, %v411_v34  ;;  %v2419_v34 = vld [vmem:[#allocation18_spill] sm:$0xff] }
  0xef   :  { %v2063_v4 = vpop.f32.mrf.mxu2 }
  0xf0   :  { %v413_v42 = vmul.f32 %v1325_v20, %v412_v58  ;;  %v2422_v58 = vld [vmem:[#allocation19_spill] sm:$0xff]  ;;  %2426 = vst [vmem:[#allocation38_spill] sm:$0xff] %v2063_v4 }
  0xf2   :  { %v414_v16 = vadd.f32 %v1325_v20, %v413_v42  ;;  %v2420_v42 = vld [vmem:[#allocation25_spill] sm:$0xff] }
  0xf4   :  { %v418_v61 = vsel %vm417_vm7, %v1325_v20, %v414_v16  ;;  %v2423_v20 = vld [vmem:[#allocation26_spill] sm:$0xff]  ;;  %v2061_v9 = vpop.f32.mrf.mxu1 }
  0xf5   :  { %v423_v63 = vsel %vm420_vm8, %v422_v62, %v418_v61  ;;  %2425 = vst [vmem:[#allocation37_spill] sm:$0xff] %v2061_v9  ;;  %v2435_v9 = vld [vmem:[#allocation27_spill] sm:$0xff] }
  0xf6   :  { %v451_v26 = vsub.f32 1.0, %v423_v63  ;;  %v453_v36 = vmul.f32 0.0, %v423_v63 }
  0xf7   :  { %v2067_v62 = vpop.f32.mrf.mxu2 }
  0xf8   :  { %v452_v39 = vmul.f32 %v1327_v30, %v451_v26  ;;  %2428 = vst [vmem:[#allocation40_spill] sm:$0xff] %v2067_v62 }
  0xfa   :  { %v2005_v48 = vadd.f32 %v453_v36, %v452_v39 }
  0xfc   :  { %455 = vst [vmem:[#allocation12] sm:$0xff] %v2005_v48  ;;  %475 = vmatmul.f32.vlgmr.msrb.gmra.mxu1 %v2005_v48  ;;  %515 = vmatmul.f32.vlgmr.msrb.gmra.mxu2 %v2005_v48  ;;  %v2065_v16 = vpop.f32.mrf.mxu1 }
  0xfd   :  { %555 = vmatmul.f32.vlgmr.msra.gmra.mxu3 %v2005_v48  ;;  %763 = vmatpush.msrb.mxu1 %v1656_v7  ;;  %2427 = vst [vmem:[#allocation39_spill] sm:$0xff] %v2065_v16 }
  0xfe   :  { %795 = vmatpush.msrb.mxu2 %v1638_v0  ;;  %835 = vmatpush.msra.mxu3 %v1748_v37 }
  0xff   :  { %764 = vmatpush.msrb.mxu1 %v1663_v10  ;;  %v2071_v63 = vpop.f32.mrf.mxu2 }
 0x100   :  { %796 = vmatpush.msrb.mxu2 %v1640_v1  ;;  %836 = vmatpush.msra.mxu3 %v1757_v40  ;;  %2430 = vst [vmem:[#allocation42_spill] sm:$0xff] %v2071_v63 }
 0x101   :  { %765 = vmatpush.msrb.mxu1 %v1666_v11 }
 0x102   :  { %797 = vmatpush.msrb.mxu2 %v1643_v3  ;;  %837 = vmatpush.msra.mxu3 %v1766_v43 }
 0x103   :  { %766 = vmatpush.msrb.mxu1 %v1674_v13 }
 0x104   :  { %798 = vmatpush.msrb.mxu2 %v1650_v5  ;;  %838 = vmatpush.msra.mxu3 %v1775_v45  ;;  %v2069_v61 = vpop.f32.mrf.mxu1 }
 0x105   :  { %767 = vmatpush.msrb.mxu1 %v1680_v15  ;;  %2429 = vst [vmem:[#allocation41_spill] sm:$0xff] %v2069_v61 }
 0x106   :  { %799 = vmatpush.msrb.mxu2 %v1653_v6  ;;  %839 = vmatpush.msra.mxu3 %v1782_v46 }
 0x107   :  { %768 = vmatpush.msrb.mxu1 %v1690_v18  ;;  %v2075_v30 = vpop.f32.mrf.mxu2 }
 0x108   :  { %800 = vmatpush.msrb.mxu2 %v1658_v8  ;;  %840 = vmatpush.msra.mxu3 %v1789_v47  ;;  %2432 = vst [vmem:[#allocation44_spill] sm:$0xff] %v2075_v30 }
 0x109   :  { %769 = vmatpush.msrb.mxu1 %v1698_v21 }
 0x10a   :  { %801 = vmatpush.msrb.mxu2 %v1668_v12  ;;  %841 = vmatpush.msra.mxu3 %v1797_v49 }
 0x10b   :  { %770 = vmatpush.msrb.mxu1 %v1706_v23 }
 0x10c   :  { %802 = vmatpush.msrb.mxu2 %v1676_v14  ;;  %842 = vmatpush.msra.mxu3 %v1804_v50  ;;  %v2073_v26 = vpop.f32.mrf.mxu1 }
 0x10d   :  { %771 = vmatpush.msrb.mxu1 %v1712_v25  ;;  %2431 = vst [vmem:[#allocation43_spill] sm:$0xff] %v2073_v26 }
 0x10e   :  { %803 = vmatpush.msrb.mxu2 %v1684_v17  ;;  %843 = vmatpush.msra.mxu3 %v1811_v51 }
 0x10f   :  { %772 = vmatpush.msrb.mxu1 %v1718_v28  ;;  %v2079_v36 = vpop.f32.mrf.mxu2 }
 0x110   :  { %804 = vmatpush.msrb.mxu2 %v1692_v19  ;;  %844 = vmatpush.msra.mxu3 %v1818_v52  ;;  %2434 = vst [vmem:[#allocation46_spill] sm:$0xff] %v2079_v36 }
 0x111   :  { %773 = vmatpush.msrb.mxu1 %v1728_v31 }
 0x112   :  { %805 = vmatpush.msrb.mxu2 %v1700_v22  ;;  %845 = vmatpush.msra.mxu3 %v1826_v54 }
 0x113   :  { %774 = vmatpush.msrb.mxu1 %v1739_v33 }
 0x114   :  { %806 = vmatpush.msrb.mxu2 %v1708_v24  ;;  %846 = vmatpush.msra.mxu3 %v1833_v55  ;;  %v2077_v39 = vpop.f32.mrf.mxu1 }
 0x115   :  { %775 = vmatpush.msrb.mxu1 %v1746_v35  ;;  %2433 = vst [vmem:[#allocation45_spill] sm:$0xff] %v2077_v39 }
 0x116   :  { %807 = vmatpush.msrb.mxu2 %v1714_v27  ;;  %847 = vmatpush.msra.mxu3 %v1840_v56 }
 0x117   :  { %776 = vmatpush.msrb.mxu1 %v1752_v38 }
 0x118   :  { %808 = vmatpush.msrb.mxu2 %v1722_v29  ;;  %848 = vmatpush.msra.mxu3 %v1847_v57 }
 0x119   :  { %777 = vmatpush.msrb.mxu1 %v2418_v32 }
 0x11a   :  { %809 = vmatpush.msrb.mxu2 %v2419_v34  ;;  %849 = vmatpush.msra.mxu3 %v2420_v42 }
 0x11b   :  { %778 = vmatpush.msrb.mxu1 %v2421_v44 }
 0x11c   :  { %810 = vmatpush.msrb.mxu2 %v2422_v58  ;;  %850 = vmatpush.msra.mxu3 %v2423_v20  ;;  %v2436_v58 = vld [vmem:[#allocation34_spill] sm:$0xff] }
 0x11d   :  { %v204_v16 = vadd.f32 %v2436_v58, %v203_v60 }
 0x179   :  { %v476_v53 = vpop.f32.mrf.mxu1 }
 0x17a   :  { %v479_v20 = vadd.f32 %v476_v53, %v2435_v9 }
 0x17c   :  { %v1288_v4 = vmul.f32 -1.442695, %v479_v20 }
 0x17e   :  { %1328 = vpow2.f32 %v1288_v4 }
 0x17f   :  { %v516_v62 = vpop.f32.mrf.mxu2 }
 0x180   :  { %v519_v44 = vadd.f32 %v516_v62, %v204_v16  ;;  %v556_v60 = vpop.f32.mrf.mxu3 }
 0x181   :  { %v557_v62 = vadd.f32 %v1999_v2, %v556_v60 }
 0x182   :  { %v1289_v61 = vmul.f32 -1.442695, %v519_v44 }
 0x184   :  { %v1329_v42 = vpop.eup %1328  ;;  %1330 = vpow2.f32 %v1289_v61  ;;  %v261_v61 = vadd.f32 %v2002_v41, %v260_v59 }
 0x185   :  { %v483_v63 = vadd.f32 1.0, %v1329_v42 }
 0x187   :  { %1332 = vrcp.f32 %v483_v63  ;;  %v495_v32 = vand.u32 2147483648, %v483_v63  ;;  %v493_v20 = vand.u32 2147483647, %v483_v63  ;;  %vm489_vm10 = vweird.f32 %v483_v63 }
 0x189   :  { %v496_v44 = vor.u32 1.1754944e-38, %v495_v32  ;;  %vm494_vm12 = vcmp.eq.f32.partialorder %v493_v20, 8.507059e+37 }
 0x18a   :  { %v1331_v26 = vpop.eup %1330 }
 0x18b   :  { %v523_v30 = vadd.f32 1.0, %v1331_v26 }
 0x18d   :  { %v1333_v34 = vpop.eup %1332  ;;  %1334 = vrcp.f32 %v523_v30  ;;  %v533_v29 = vand.u32 2147483647, %v523_v30  ;;  %vm529_vm14 = vweird.f32 %v523_v30 }
 0x18e   :  { %v485_v39 = vmul.f32 %v1333_v34, %v483_v63  ;;  %vm490_vm9 = vweird.f32 %v1333_v34 }
 0x18f   :  { %vm491_vm11 = vmor %vm489_vm10, %vm490_vm9  ;;  %vm534_vm0 = vcmp.eq.f32.partialorder %v533_v29, 8.507059e+37 }
 0x190   :  { %v486_v36 = vsub.f32 1.0, %v485_v39 }
 0x192   :  { %v487_v57 = vmul.f32 %v1333_v34, %v486_v36  ;;  %v535_v36 = vand.u32 2147483648, %v523_v30 }
 0x193   :  { %v1335_v53 = vpop.eup %1334 }
 0x194   :  { %v525_v9 = vmul.f32 %v1335_v53, %v523_v30  ;;  %v488_v4 = vadd.f32 %v1333_v34, %v487_v57  ;;  %vm530_vm13 = vweird.f32 %v1335_v53  ;;  %v536_v57 = vor.u32 1.1754944e-38, %v535_v36  ;;  %v2450_v36 = vld [vmem:[#allocation36_spill] sm:$0xff] }
 0x195   :  { %vm531_vm15 = vmor %vm529_vm14, %vm530_vm13 }
 0x196   :  { %v526_v16 = vsub.f32 1.0, %v525_v9  ;;  %v492_v42 = vsel %vm491_vm11, %v1333_v34, %v488_v4 }
 0x197   :  { %v497_v26 = vsel %vm494_vm12, %v496_v44, %v492_v42 }
 0x198   :  { %v527_v39 = vmul.f32 %v1335_v53, %v526_v16  ;;  %v559_v58 = vmul.f32 %v557_v62, %v497_v26 }
 0x19a   :  { %v528_v38 = vadd.f32 %v1335_v53, %v527_v39  ;;  %v560_v56 = vadd.f32 %v559_v58, %v261_v61 }
 0x19c   :  { %v532_v63 = vsel %vm531_vm15, %v1335_v53, %v528_v38  ;;  %1336 = vtanh.f32 %v560_v56 }
 0x19d   :  { %v537_v32 = vsel %vm534_vm0, %v536_v57, %v532_v63  ;;  %v264_v57 = vadd.f32 %v2002_v41, %v2450_v36 }
 0x19e   :  { %v562_v34 = vsub.f32 1.0, %v537_v32  ;;  %v564_v59 = vmul.f32 %v537_v32, %v2005_v48 }
 0x1a2   :  { %v1337_v20 = vpop.eup %1336 }
 0x1a3   :  { %v563_v60 = vmul.f32 %v1337_v20, %v562_v34 }
 0x1a5   :  { %v2086_v9 = vadd.f32 %v564_v59, %v563_v60 }
 0x1a7   :  { %567 = vst [vmem:[#allocation12 + $0x8] sm:$0xff] %v2086_v9  ;;  %587 = vmatmul.f32.vlgmr.msra.gmra.mxu0 %v2086_v9  ;;  %627 = vmatmul.f32.vlgmr.msra.gmra.mxu1 %v2086_v9 }
 0x1a8   :  { %667 = vmatmul.f32.vlgmr.msra.gmra.mxu2 %v2086_v9  ;;  %875 = vmatpush.msra.mxu0 %v1656_v7  ;;  %v2442_v7 = vld [vmem:[#allocation18_spill] sm:$0xff] }
 0x1a9   :  { %907 = vmatpush.msra.mxu1 %v1638_v0  ;;  %947 = vmatpush.msra.mxu2 %v1748_v37  ;;  %v2437_v0 = vld [vmem:[#allocation23_spill] sm:$0xff] }
 0x1aa   :  { %876 = vmatpush.msra.mxu0 %v1663_v10  ;;  %v2444_v10 = vld [vmem:[#allocation22_spill] sm:$0xff] }
 0x1ab   :  { %908 = vmatpush.msra.mxu1 %v1640_v1  ;;  %948 = vmatpush.msra.mxu2 %v1757_v40  ;;  %v2438_v1 = vld [vmem:[#allocation20_spill] sm:$0xff] }
 0x1ac   :  { %877 = vmatpush.msra.mxu0 %v1666_v11  ;;  %v2445_v11 = vld [vmem:[#allocation19_spill] sm:$0xff] }
 0x1ad   :  { %909 = vmatpush.msra.mxu1 %v1643_v3  ;;  %949 = vmatpush.msra.mxu2 %v1766_v43  ;;  %v2439_v3 = vld [vmem:[#allocation17_spill] sm:$0xff] }
 0x1ae   :  { %878 = vmatpush.msra.mxu0 %v1674_v13  ;;  %v2447_v13 = vld [vmem:[#allocation37_spill] sm:$0xff] }
 0x1af   :  { %910 = vmatpush.msra.mxu1 %v1650_v5  ;;  %950 = vmatpush.msra.mxu2 %v1775_v45  ;;  %v2440_v5 = vld [vmem:[#allocation24_spill] sm:$0xff] }
 0x1b0   :  { %879 = vmatpush.msra.mxu0 %v1680_v15 }
 0x1b1   :  { %911 = vmatpush.msra.mxu1 %v1653_v6  ;;  %951 = vmatpush.msra.mxu2 %v1782_v46  ;;  %v2441_v6 = vld [vmem:[#allocation21_spill] sm:$0xff] }
 0x1b2   :  { %880 = vmatpush.msra.mxu0 %v1690_v18 }
 0x1b3   :  { %912 = vmatpush.msra.mxu1 %v1658_v8  ;;  %952 = vmatpush.msra.mxu2 %v1789_v47  ;;  %v2443_v8 = vld [vmem:[#allocation25_spill] sm:$0xff] }
 0x1b4   :  { %881 = vmatpush.msra.mxu0 %v1698_v21 }
 0x1b5   :  { %913 = vmatpush.msra.mxu1 %v1668_v12  ;;  %953 = vmatpush.msra.mxu2 %v1797_v49  ;;  %v2446_v12 = vld [vmem:[#allocation26_spill] sm:$0xff] }
 0x1b6   :  { %882 = vmatpush.msra.mxu0 %v1706_v23 }
 0x1b7   :  { %914 = vmatpush.msra.mxu1 %v1676_v14  ;;  %954 = vmatpush.msra.mxu2 %v1804_v50  ;;  %v2448_v14 = vld [vmem:[#allocation34_spill] sm:$0xff] }
 0x1b8   :  { %883 = vmatpush.msra.mxu0 %v1712_v25  ;;  %v207_v15 = vadd.f32 %v2448_v14, %v2447_v13  ;;  %v2153_v13 = vld [vmem:[#allocation9 + $0x178] sm:$0xff] }
 0x1b9   :  { %915 = vmatpush.msra.mxu1 %v1684_v17  ;;  %955 = vmatpush.msra.mxu2 %v1811_v51 }
 0x1ba   :  { %884 = vmatpush.msra.mxu0 %v1718_v28 }
 0x1bb   :  { %916 = vmatpush.msra.mxu1 %v1692_v19  ;;  %956 = vmatpush.msra.mxu2 %v1818_v52  ;;  %v2449_v19 = vld [vmem:[#allocation28_spill] sm:$0xff] }
 0x1bc   :  { %885 = vmatpush.msra.mxu0 %v1728_v31 }
 0x1bd   :  { %917 = vmatpush.msra.mxu1 %v1700_v22  ;;  %957 = vmatpush.msra.mxu2 %v1826_v54 }
 0x1be   :  { %886 = vmatpush.msra.mxu0 %v1739_v33 }
 0x1bf   :  { %918 = vmatpush.msra.mxu1 %v1708_v24  ;;  %958 = vmatpush.msra.mxu2 %v1833_v55 }
 0x1c0   :  { %887 = vmatpush.msra.mxu0 %v1746_v35 }
 0x1c1   :  { %919 = vmatpush.msra.mxu1 %v1714_v27  ;;  %959 = vmatpush.msra.mxu2 %v2437_v0 }
 0x1c2   :  { %888 = vmatpush.msra.mxu0 %v2438_v1 }
 0x1c3   :  { %920 = vmatpush.msra.mxu1 %v2439_v3  ;;  %960 = vmatpush.msra.mxu2 %v2440_v5 }
 0x1c4   :  { %889 = vmatpush.msra.mxu0 %v2441_v6 }
 0x1c5   :  { %921 = vmatpush.msra.mxu1 %v2442_v7  ;;  %961 = vmatpush.msra.mxu2 %v2443_v8 }
 0x1c6   :  { %890 = vmatpush.msra.mxu0 %v2444_v10 }
 0x1c7   :  { %922 = vmatpush.msra.mxu1 %v2445_v11  ;;  %962 = vmatpush.msra.mxu2 %v2446_v12 }
 0x224   :  { %v588_v17 = vpop.f32.mrf.mxu0  ;;  %v628_v18 = vpop.f32.mrf.mxu1 }
 0x225   :  { %v591_v21 = vadd.f32 %v588_v17, %v2449_v19  ;;  %v631_v22 = vadd.f32 %v628_v18, %v207_v15  ;;  %v2156_v15 = vld [vmem:[#allocation9 + $0x78] sm:$0xff]  ;;  %v2163_v17 = vld [vmem:[#allocation9 + $0x70] sm:$0xff]  ;;  %v2167_v18 = vld [vmem:[#allocation9 + $0x168] sm:$0xff] }
 0x226   :  { %v2170_v19 = vld [vmem:[#allocation9 + $0x68] sm:$0xff] }
 0x227   :  { %v1290_v23 = vmul.f32 -1.442695, %v591_v21  ;;  %v1291_v24 = vmul.f32 -1.442695, %v631_v22  ;;  %v2177_v21 = vld [vmem:[#allocation9 + $0x60] sm:$0xff]  ;;  %v2184_v22 = vld [vmem:[#allocation9 + $0x58] sm:$0xff] }
 0x229   :  { %1338 = vpow2.f32 %v1290_v23  ;;  %v2191_v23 = vld [vmem:[#allocation9 + $0x50] sm:$0xff] }
 0x22a   :  { %1340 = vpow2.f32 %v1291_v24  ;;  %v2198_v24 = vld [vmem:[#allocation9 + $0x48] sm:$0xff] }
 0x22b   :  { %v668_v44 = vpop.f32.mrf.mxu2 }
 0x22c   :  { %v669_v61 = vadd.f32 %v1999_v2, %v668_v44  ;;  %v2452_v44 = vld [vmem:[#allocation30_spill] sm:$0xff] }
 0x22f   :  { %v1339_v25 = vpop.eup %1338 }
 0x230   :  { %v1341_v27 = vpop.eup %1340  ;;  %v595_v28 = vadd.f32 1.0, %v1339_v25  ;;  %v2205_v25 = vld [vmem:[#allocation9 + $0x40] sm:$0xff] }
 0x231   :  { %v635_v29 = vadd.f32 1.0, %v1341_v27  ;;  %v2212_v27 = vld [vmem:[#allocation9 + $0x38] sm:$0xff] }
 0x232   :  { %1342 = vrcp.f32 %v595_v28  ;;  %v607_v58 = vand.u32 2147483648, %v595_v28  ;;  %v605_v53 = vand.u32 2147483647, %v595_v28  ;;  %vm601_vm2 = vweird.f32 %v595_v28 }
 0x233   :  { %1344 = vrcp.f32 %v635_v29  ;;  %v647_v63 = vand.u32 2147483648, %v635_v29  ;;  %vm641_vm6 = vweird.f32 %v635_v29  ;;  %v645_v34 = vand.u32 2147483647, %v635_v29 }
 0x234   :  { %v608_v42 = vor.u32 1.1754944e-38, %v607_v58  ;;  %vm606_vm4 = vcmp.eq.f32.partialorder %v605_v53, 8.507059e+37 }
 0x235   :  { %v648_v59 = vor.u32 1.1754944e-38, %v647_v63  ;;  %vm646_vm8 = vcmp.eq.f32.partialorder %v645_v34, 8.507059e+37 }
 0x238   :  { %v1343_v31 = vpop.eup %1342 }
 0x239   :  { %v1345_v33 = vpop.eup %1344  ;;  %v597_v35 = vmul.f32 %v1343_v31, %v595_v28  ;;  %vm602_vm1 = vweird.f32 %v1343_v31  ;;  %v2219_v28 = vld [vmem:[#allocation9 + $0x30] sm:$0xff] }
 0x23a   :  { %v637_v38 = vmul.f32 %v1345_v33, %v635_v29  ;;  %vm603_vm3 = vmor %vm601_vm2, %vm602_vm1  ;;  %vm642_vm5 = vweird.f32 %v1345_v33  ;;  %v2226_v29 = vld [vmem:[#allocation9 + $0x28] sm:$0xff] }
 0x23b   :  { %v598_v56 = vsub.f32 1.0, %v597_v35  ;;  %vm643_vm7 = vmor %vm641_vm6, %vm642_vm5  ;;  %v2247_v35 = vld [vmem:[#allocation9 + $0x10] sm:$0xff] }
 0x23c   :  { %v638_v48 = vsub.f32 1.0, %v637_v38  ;;  %v2254_v38 = vld [vmem:[#allocation9 + $0x8] sm:$0xff] }
 0x23d   :  { %v599_v30 = vmul.f32 %v1343_v31, %v598_v56  ;;  %v2261_v56 = vld [vmem:[#allocation9] sm:$0xff] }
 0x23e   :  { %v639_v4 = vmul.f32 %v1345_v33, %v638_v48 }
 0x23f   :  { %v600_v16 = vadd.f32 %v1343_v31, %v599_v30 }
 0x240   :  { %v640_v26 = vadd.f32 %v1345_v33, %v639_v4 }
 0x241   :  { %v604_v62 = vsel %vm603_vm3, %v1343_v31, %v600_v16  ;;  %v2233_v31 = vld [vmem:[#allocation9 + $0x20] sm:$0xff] }
 0x242   :  { %v609_v39 = vsel %vm606_vm4, %v608_v42, %v604_v62  ;;  %v644_v60 = vsel %vm643_vm7, %v1345_v33, %v640_v26  ;;  %v2240_v33 = vld [vmem:[#allocation9 + $0x18] sm:$0xff] }
 0x243   :  { %v671_v32 = vmul.f32 %v669_v61, %v609_v39  ;;  %v649_v1 = vsel %vm646_vm8, %v648_v59, %v644_v60 }
 0x244   :  { %v674_v3 = vsub.f32 1.0, %v649_v1  ;;  %v676_v10 = vmul.f32 %v649_v1, %v2086_v9  ;;  %v2160_v9 = vld [vmem:[#allocation9 + $0x170] sm:$0xff] }
 0x245   :  { %v672_v20 = vadd.f32 %v671_v32, %v264_v57 }
 0x247   :  { %1346 = vtanh.f32 %v672_v20 }
 0x24d   :  { %v1347_v6 = vpop.eup %1346 }
 0x24e   :  { %v675_v7 = vmul.f32 %v1347_v6, %v674_v3 }
 0x250   :  { %v2147_v11 = vadd.f32 %v676_v10, %v675_v7 }
 0x252   :  { %679 = vst [vmem:[#allocation12 + $0x10] sm:$0xff] %v2147_v11  ;;  %699 = vmatmul.f32.vlgmr.msrb.gmra.mxu3 %v2147_v11  ;;  %739 = vmatmul.f32.vlgmr.msrb.gmra.mxu0 %v2147_v11 }
 0x253   :  { %779 = vmatmul.f32.vlgmr.msrb.gmra.mxu1 %v2147_v11  ;;  %987 = vmatpush.msrb.mxu3 %v2153_v13 }
 0x254   :  { %1019 = vmatpush.msrb.mxu0 %v2156_v15  ;;  %1059 = vmatpush.msrb.mxu1 %v1748_v37  ;;  %v2174_v37 = vld [vmem:[#allocation9 + $0x160] sm:$0xff] }
 0x255   :  { %988 = vmatpush.msrb.mxu3 %v2160_v9 }
 0x256   :  { %1020 = vmatpush.msrb.mxu0 %v2163_v17  ;;  %1060 = vmatpush.msrb.mxu1 %v1757_v40  ;;  %v2181_v40 = vld [vmem:[#allocation9 + $0x158] sm:$0xff] }
 0x257   :  { %989 = vmatpush.msrb.mxu3 %v2167_v18 }
 0x258   :  { %1021 = vmatpush.msrb.mxu0 %v2170_v19  ;;  %1061 = vmatpush.msrb.mxu1 %v1766_v43  ;;  %v2188_v43 = vld [vmem:[#allocation9 + $0x150] sm:$0xff] }
 0x259   :  { %990 = vmatpush.msrb.mxu3 %v2174_v37 }
 0x25a   :  { %1022 = vmatpush.msrb.mxu0 %v2177_v21  ;;  %1062 = vmatpush.msrb.mxu1 %v1775_v45  ;;  %v2195_v45 = vld [vmem:[#allocation9 + $0x148] sm:$0xff] }
 0x25b   :  { %991 = vmatpush.msrb.mxu3 %v2181_v40 }
 0x25c   :  { %1023 = vmatpush.msrb.mxu0 %v2184_v22  ;;  %1063 = vmatpush.msrb.mxu1 %v1782_v46  ;;  %v2202_v46 = vld [vmem:[#allocation9 + $0x140] sm:$0xff] }
 0x25d   :  { %992 = vmatpush.msrb.mxu3 %v2188_v43 }
 0x25e   :  { %1024 = vmatpush.msrb.mxu0 %v2191_v23  ;;  %1064 = vmatpush.msrb.mxu1 %v1789_v47  ;;  %v2209_v47 = vld [vmem:[#allocation9 + $0x138] sm:$0xff] }
 0x25f   :  { %993 = vmatpush.msrb.mxu3 %v2195_v45 }
 0x260   :  { %1025 = vmatpush.msrb.mxu0 %v2198_v24  ;;  %1065 = vmatpush.msrb.mxu1 %v1797_v49  ;;  %v2216_v49 = vld [vmem:[#allocation9 + $0x130] sm:$0xff] }
 0x261   :  { %994 = vmatpush.msrb.mxu3 %v2202_v46 }
 0x262   :  { %1026 = vmatpush.msrb.mxu0 %v2205_v25  ;;  %1066 = vmatpush.msrb.mxu1 %v1804_v50  ;;  %v2223_v50 = vld [vmem:[#allocation9 + $0x128] sm:$0xff] }
 0x263   :  { %995 = vmatpush.msrb.mxu3 %v2209_v47 }
 0x264   :  { %1027 = vmatpush.msrb.mxu0 %v2212_v27  ;;  %1067 = vmatpush.msrb.mxu1 %v1811_v51  ;;  %v2230_v51 = vld [vmem:[#allocation9 + $0x120] sm:$0xff] }
 0x265   :  { %996 = vmatpush.msrb.mxu3 %v2216_v49 }
 0x266   :  { %1028 = vmatpush.msrb.mxu0 %v2219_v28  ;;  %1068 = vmatpush.msrb.mxu1 %v1818_v52  ;;  %v2237_v52 = vld [vmem:[#allocation9 + $0x118] sm:$0xff] }
 0x267   :  { %997 = vmatpush.msrb.mxu3 %v2223_v50 }
 0x268   :  { %1029 = vmatpush.msrb.mxu0 %v2226_v29  ;;  %1069 = vmatpush.msrb.mxu1 %v1826_v54  ;;  %v2244_v54 = vld [vmem:[#allocation9 + $0x110] sm:$0xff] }
 0x269   :  { %998 = vmatpush.msrb.mxu3 %v2230_v51 }
 0x26a   :  { %1030 = vmatpush.msrb.mxu0 %v2233_v31  ;;  %1070 = vmatpush.msrb.mxu1 %v1833_v55  ;;  %v2251_v55 = vld [vmem:[#allocation9 + $0x108] sm:$0xff] }
 0x26b   :  { %999 = vmatpush.msrb.mxu3 %v2237_v52 }
 0x26c   :  { %1031 = vmatpush.msrb.mxu0 %v2240_v33  ;;  %1071 = vmatpush.msrb.mxu1 %v2437_v0  ;;  %v2258_v0 = vld [vmem:[#allocation9 + $0x100] sm:$0xff] }
 0x26d   :  { %1000 = vmatpush.msrb.mxu3 %v2244_v54 }
 0x26e   :  { %1032 = vmatpush.msrb.mxu0 %v2247_v35  ;;  %1072 = vmatpush.msrb.mxu1 %v2440_v5  ;;  %v2451_v5 = vld [vmem:[#allocation39_spill] sm:$0xff] }
 0x26f   :  { %1001 = vmatpush.msrb.mxu3 %v2251_v55  ;;  %v210_v48 = vadd.f32 %v2448_v14, %v2451_v5 }
 0x270   :  { %1033 = vmatpush.msrb.mxu0 %v2254_v38  ;;  %1073 = vmatpush.msrb.mxu1 %v2443_v8 }
 0x271   :  { %1002 = vmatpush.msrb.mxu3 %v2258_v0 }
 0x272   :  { %1034 = vmatpush.msrb.mxu0 %v2261_v56  ;;  %1074 = vmatpush.msrb.mxu1 %v2446_v12 }
 0x2cf   :  { %v740_v58 = vpop.f32.mrf.mxu0 }
 0x2d0   :  { %v743_v30 = vadd.f32 %v740_v58, %v210_v48  ;;  %v780_v1 = vpop.f32.mrf.mxu1  ;;  %v2453_v58 = vld [vmem:[#allocation38_spill] sm:$0xff] }
 0x2d1   :  { %v781_v7 = vadd.f32 %v1999_v2, %v780_v1 }
 0x2d2   :  { %v1293_v53 = vmul.f32 -1.442695, %v743_v30  ;;  %v267_v30 = vadd.f32 %v2002_v41, %v2453_v58 }
 0x2d4   :  { %1348 = vpow2.f32 %v1293_v53 }
 0x2d5   :  { %v700_v4 = vpop.f32.mrf.mxu3 }
 0x2d6   :  { %v703_v8 = vadd.f32 %v700_v4, %v2452_v44 }
 0x2d8   :  { %v1292_v16 = vmul.f32 -1.442695, %v703_v8 }
 0x2da   :  { %v1349_v42 = vpop.eup %1348  ;;  %1350 = vpow2.f32 %v1292_v16 }
 0x2db   :  { %v747_v62 = vadd.f32 1.0, %v1349_v42 }
 0x2dd   :  { %1352 = vrcp.f32 %v747_v62  ;;  %v759_v53 = vand.u32 2147483648, %v747_v62  ;;  %vm753_vm14 = vweird.f32 %v747_v62  ;;  %v757_v44 = vand.u32 2147483647, %v747_v62 }
 0x2df   :  { %v760_v42 = vor.u32 1.1754944e-38, %v759_v53  ;;  %vm758_vm0 = vcmp.eq.f32.partialorder %v757_v44, 8.507059e+37 }
 0x2e0   :  { %v1351_v61 = vpop.eup %1350 }
 0x2e1   :  { %v707_v26 = vadd.f32 1.0, %v1351_v61 }
 0x2e3   :  { %1354 = vrcp.f32 %v707_v26  ;;  %v1353_v39 = vpop.eup %1352  ;;  %v719_v34 = vand.u32 2147483648, %v707_v26  ;;  %v717_v60 = vand.u32 2147483647, %v707_v26  ;;  %vm713_vm10 = vweird.f32 %v707_v26 }
 0x2e4   :  { %v749_v12 = vmul.f32 %v1353_v39, %v747_v62  ;;  %vm754_vm13 = vweird.f32 %v1353_v39  ;;  %v1430_v62 = vld [vmem:[#allocation9 + $0xf8] sm:$0xff] }
 0x2e5   :  { %v720_v6 = vor.u32 1.1754944e-38, %v719_v34  ;;  %vm718_vm12 = vcmp.eq.f32.partialorder %v717_v60, 8.507059e+37  ;;  %vm755_vm15 = vmor %vm753_vm14, %vm754_vm13 }
 0x2e6   :  { %v750_v63 = vsub.f32 1.0, %v749_v12 }
 0x2e8   :  { %v751_v59 = vmul.f32 %v1353_v39, %v750_v63 }
 0x2e9   :  { %v1355_v36 = vpop.eup %1354 }
 0x2ea   :  { %v709_v57 = vmul.f32 %v1355_v36, %v707_v26  ;;  %vm714_vm9 = vweird.f32 %v1355_v36  ;;  %v752_v5 = vadd.f32 %v1353_v39, %v751_v59 }
 0x2eb   :  { %vm715_vm11 = vmor %vm713_vm10, %vm714_vm9 }
 0x2ec   :  { %v710_v32 = vsub.f32 1.0, %v709_v57  ;;  %v756_v16 = vsel %vm755_vm15, %v1353_v39, %v752_v5  ;;  %v1432_v39 = vld [vmem:[#allocation9 + $0xe8] sm:$0xff] }
 0x2ed   :  { %v761_v61 = vsel %vm758_vm0, %v760_v42, %v756_v16 }
 0x2ee   :  { %v711_v20 = vmul.f32 %v1355_v36, %v710_v32  ;;  %v786_v26 = vsub.f32 1.0, %v761_v61  ;;  %v788_v57 = vmul.f32 %v761_v61, %v2147_v11  ;;  %v1431_v11 = vld [vmem:[#allocation9 + $0xf0] sm:$0xff]  ;;  %v1433_v32 = vld [vmem:[#allocation9 + $0xe0] sm:$0xff] }
 0x2f0   :  { %v712_v3 = vadd.f32 %v1355_v36, %v711_v20 }
 0x2f2   :  { %v716_v10 = vsel %vm715_vm11, %v1355_v36, %v712_v3 }
 0x2f3   :  { %v721_v48 = vsel %vm718_vm12, %v720_v6, %v716_v10 }
 0x2f4   :  { %v783_v4 = vmul.f32 %v781_v7, %v721_v48 }
 0x2f6   :  { %v784_v8 = vadd.f32 %v783_v4, %v267_v30 }
 0x2f8   :  { %1356 = vtanh.f32 %v784_v8 }
 0x2fe   :  { %v1357_v12 = vpop.eup %1356 }
 0x2ff   :  { %v787_v36 = vmul.f32 %v1357_v12, %v786_v26 }
 0x301   :  { %v2272_v63 = vadd.f32 %v788_v57, %v787_v36 }
 0x303   :  { %791 = vst [vmem:[#allocation12 + $0x18] sm:$0xff] %v2272_v63  ;;  %811 = vmatmul.f32.vlgmr.msrb.gmra.mxu2 %v2272_v63  ;;  %851 = vmatmul.f32.vlgmr.msra.gmra.mxu3 %v2272_v63 }
 0x304   :  { %891 = vmatmul.f32.vlgmr.msra.gmra.mxu0 %v2272_v63  ;;  %1099 = vmatpush.msrb.mxu2 %v2153_v13 }
 0x305   :  { %1131 = vmatpush.msra.mxu3 %v2156_v15  ;;  %1171 = vmatpush.msra.mxu0 %v1430_v62  ;;  %v1434_v15 = vld [vmem:[#allocation9 + $0xd8] sm:$0xff] }
 0x306   :  { %1100 = vmatpush.msrb.mxu2 %v2160_v9 }
 0x307   :  { %1132 = vmatpush.msra.mxu3 %v2163_v17  ;;  %1172 = vmatpush.msra.mxu0 %v1431_v11  ;;  %v1435_v17 = vld [vmem:[#allocation9 + $0xd0] sm:$0xff]  ;;  %v2456_v11 = vld [vmem:[#allocation40_spill] sm:$0xff] }
 0x308   :  { %1101 = vmatpush.msrb.mxu2 %v2167_v18 }
 0x309   :  { %1133 = vmatpush.msra.mxu3 %v2170_v19  ;;  %1173 = vmatpush.msra.mxu0 %v1432_v39  ;;  %v1436_v19 = vld [vmem:[#allocation9 + $0xc8] sm:$0xff]  ;;  %v270_v39 = vadd.f32 %v2002_v41, %v2456_v11 }
 0x30a   :  { %1102 = vmatpush.msrb.mxu2 %v2174_v37 }
 0x30b   :  { %1134 = vmatpush.msra.mxu3 %v2177_v21  ;;  %1174 = vmatpush.msra.mxu0 %v1433_v32  ;;  %v1437_v21 = vld [vmem:[#allocation9 + $0xc0] sm:$0xff] }
 0x30c   :  { %1103 = vmatpush.msrb.mxu2 %v2181_v40 }
 0x30d   :  { %1135 = vmatpush.msra.mxu3 %v2184_v22  ;;  %1175 = vmatpush.msra.mxu0 %v1434_v15  ;;  %v1438_v22 = vld [vmem:[#allocation9 + $0xb8] sm:$0xff] }
 0x30e   :  { %1104 = vmatpush.msrb.mxu2 %v2188_v43 }
 0x30f   :  { %1136 = vmatpush.msra.mxu3 %v2191_v23  ;;  %1176 = vmatpush.msra.mxu0 %v1435_v17  ;;  %v1439_v23 = vld [vmem:[#allocation9 + $0xb0] sm:$0xff] }
 0x310   :  { %1105 = vmatpush.msrb.mxu2 %v2195_v45 }
 0x311   :  { %1137 = vmatpush.msra.mxu3 %v2198_v24  ;;  %1177 = vmatpush.msra.mxu0 %v1436_v19  ;;  %v1440_v24 = vld [vmem:[#allocation9 + $0xa8] sm:$0xff] }
 0x312   :  { %1106 = vmatpush.msrb.mxu2 %v2202_v46 }
 0x313   :  { %1138 = vmatpush.msra.mxu3 %v2205_v25  ;;  %1178 = vmatpush.msra.mxu0 %v1437_v21  ;;  %v1441_v25 = vld [vmem:[#allocation9 + $0xa0] sm:$0xff] }
 0x314   :  { %1107 = vmatpush.msrb.mxu2 %v2209_v47 }
 0x315   :  { %1139 = vmatpush.msra.mxu3 %v2212_v27  ;;  %1179 = vmatpush.msra.mxu0 %v1438_v22  ;;  %v1442_v27 = vld [vmem:[#allocation9 + $0x98] sm:$0xff] }
 0x316   :  { %1108 = vmatpush.msrb.mxu2 %v2216_v49 }
 0x317   :  { %1140 = vmatpush.msra.mxu3 %v2219_v28  ;;  %1180 = vmatpush.msra.mxu0 %v1439_v23  ;;  %v1443_v28 = vld [vmem:[#allocation9 + $0x90] sm:$0xff] }
 0x318   :  { %1109 = vmatpush.msrb.mxu2 %v2223_v50 }
 0x319   :  { %1141 = vmatpush.msra.mxu3 %v2226_v29  ;;  %1181 = vmatpush.msra.mxu0 %v1440_v24  ;;  %v1444_v29 = vld [vmem:[#allocation9 + $0x88] sm:$0xff] }
 0x31a   :  { %1110 = vmatpush.msrb.mxu2 %v2230_v51 }
 0x31b   :  { %1142 = vmatpush.msra.mxu3 %v2233_v31  ;;  %1182 = vmatpush.msra.mxu0 %v1441_v25  ;;  %v1445_v31 = vld [vmem:[#allocation9 + $0x80] sm:$0xff] }
 0x31c   :  { %1111 = vmatpush.msrb.mxu2 %v2237_v52 }
 0x31d   :  { %1143 = vmatpush.msra.mxu3 %v2240_v33  ;;  %1183 = vmatpush.msra.mxu0 %v1442_v27  ;;  %v2454_v33 = vld [vmem:[#allocation41_spill] sm:$0xff] }
 0x31e   :  { %1112 = vmatpush.msrb.mxu2 %v2244_v54  ;;  %v213_v34 = vadd.f32 %v2448_v14, %v2454_v33 }
 0x31f   :  { %1144 = vmatpush.msra.mxu3 %v2247_v35  ;;  %1184 = vmatpush.msra.mxu0 %v1443_v28  ;;  %v2455_v35 = vld [vmem:[#allocation31_spill] sm:$0xff] }
 0x320   :  { %1113 = vmatpush.msrb.mxu2 %v2251_v55 }
 0x321   :  { %1145 = vmatpush.msra.mxu3 %v2254_v38  ;;  %1185 = vmatpush.msra.mxu0 %v1444_v29 }
 0x322   :  { %1114 = vmatpush.msrb.mxu2 %v2258_v0 }
 0x323   :  { %1146 = vmatpush.msra.mxu3 %v2261_v56  ;;  %1186 = vmatpush.msra.mxu0 %v1445_v31 }
 0x381   :  { %v892_v16 = vpop.f32.mrf.mxu0 }
 0x382   :  { %v893_v12 = vadd.f32 %v1999_v2, %v892_v16 }
 0x386   :  { %v812_v20 = vpop.f32.mrf.mxu2  ;;  %v852_v60 = vpop.f32.mrf.mxu3 }
 0x387   :  { %v815_v59 = vadd.f32 %v812_v20, %v2455_v35  ;;  %v855_v1 = vadd.f32 %v852_v60, %v213_v34 }
 0x389   :  { %v1294_v3 = vmul.f32 -1.442695, %v815_v59  ;;  %v1295_v6 = vmul.f32 -1.442695, %v855_v1 }
 0x38b   :  { %1358 = vpow2.f32 %v1294_v3  ;;  %v2347_v3 = vld [vmem:[%s2377_s4] ss:$0 sm:$0xff]  ;;  %s1586_s4 = smov [#allocation12]  }
 0x38c   :  { %1360 = vpow2.f32 %v1295_v6  ;;  %s1245_s17 = sshll.u32 %s1586_s4, 4  ;;  %s1246_s17 = int_to_ptr.vmem [resolvable:$true] %s1245_s17 }
 0x391   :  { %v1359_v38 = vpop.eup %1358 }
 0x392   :  { %v1361_v7 = vpop.eup %1360  ;;  %v819_v10 = vadd.f32 1.0, %v1359_v38  ;;  %v2350_v38 = vld [vmem:[#allocation10 + $0x2] ss:$0 sm:$0xff] }
 0x393   :  { %v859_v5 = vadd.f32 1.0, %v1361_v7  ;;  %v2459_v7 = vld [vmem:[#allocation42_spill] sm:$0xff] }
 0x394   :  { %1362 = vrcp.f32 %v819_v10  ;;  %v831_v53 = vand.u32 2147483648, %v819_v10  ;;  %v829_v8 = vand.u32 2147483647, %v819_v10  ;;  %vm825_vm2 = vweird.f32 %v819_v10 }
 0x395   :  { %1364 = vrcp.f32 %v859_v5  ;;  %v871_v15 = vand.u32 2147483648, %v859_v5  ;;  %vm865_vm6 = vweird.f32 %v859_v5  ;;  %v869_v17 = vand.u32 2147483647, %v859_v5 }
 0x396   :  { %v832_v26 = vor.u32 1.1754944e-38, %v831_v53  ;;  %vm830_vm4 = vcmp.eq.f32.partialorder %v829_v8, 8.507059e+37 }
 0x397   :  { %v872_v22 = vor.u32 1.1754944e-38, %v871_v15  ;;  %vm870_vm8 = vcmp.eq.f32.partialorder %v869_v17, 8.507059e+37 }
 0x39a   :  { %v1363_v56 = vpop.eup %1362 }
 0x39b   :  { %v1365_v48 = vpop.eup %1364  ;;  %v821_v58 = vmul.f32 %v1363_v56, %v819_v10  ;;  %vm826_vm1 = vweird.f32 %v1363_v56  ;;  %v273_v10 = vadd.f32 %v2350_v38, %v2459_v7  ;;  %v2463_v7 = vld [vmem:[#allocation35_spill] sm:$0xff] }
 0x39c   :  { %v861_v30 = vmul.f32 %v1365_v48, %v859_v5  ;;  %vm827_vm3 = vmor %vm825_vm2, %vm826_vm1  ;;  %vm866_vm5 = vweird.f32 %v1365_v48 }
 0x39d   :  { %v822_v14 = vsub.f32 1.0, %v821_v58  ;;  %vm867_vm7 = vmor %vm865_vm6, %vm866_vm5 }
 0x39e   :  { %v862_v4 = vsub.f32 1.0, %v861_v30 }
 0x39f   :  { %v823_v44 = vmul.f32 %v1363_v56, %v822_v14 }
 0x3a0   :  { %v863_v42 = vmul.f32 %v1365_v48, %v862_v4 }
 0x3a1   :  { %v824_v61 = vadd.f32 %v1363_v56, %v823_v44 }
 0x3a2   :  { %v864_v62 = vadd.f32 %v1365_v48, %v863_v42 }
 0x3a3   :  { %v828_v36 = vsel %vm827_vm3, %v1363_v56, %v824_v61 }
 0x3a4   :  { %v833_v57 = vsel %vm830_vm4, %v832_v26, %v828_v36  ;;  %v868_v21 = vsel %vm867_vm7, %v1365_v48, %v864_v62  ;;  %v2460_v36 = vld [vmem:[#allocation45_spill] sm:$0xff] }
 0x3a5   :  { %v895_v32 = vmul.f32 %v893_v12, %v833_v57  ;;  %v873_v23 = vsel %vm870_vm8, %v872_v22, %v868_v21 }
 0x3a6   :  { %v898_v2 = vsub.f32 1.0, %v873_v23  ;;  %v900_v27 = vmul.f32 %v873_v23, %v2272_v63 }
 0x3a7   :  { %v896_v19 = vadd.f32 %v895_v32, %v270_v39  ;;  %v2461_v39 = vld [vmem:[#allocation33_spill] sm:$0xff] }
 0x3a9   :  { %1366 = vtanh.f32 %v896_v19 }
 0x3af   :  { %v1367_v24 = vpop.eup %1366 }
 0x3b0   :  { %v899_v25 = vmul.f32 %v1367_v24, %v898_v2 }
 0x3b2   :  { %v2317_v28 = vadd.f32 %v900_v27, %v899_v25 }
 0x3b4   :  { %903 = vst [vmem:[#allocation12 + $0x20] sm:$0xff] %v2317_v28  ;;  %923 = vmatmul.f32.vlgmr.msra.gmra.mxu1 %v2317_v28  ;;  %963 = vmatmul.f32.vlgmr.msra.gmra.mxu2 %v2317_v28 }
 0x3b5   :  { %1003 = vmatmul.f32.vlgmr.msrb.gmra.mxu3 %v2317_v28  ;;  %1211 = vmatpush.msra.mxu1 %v2153_v13  ;;  %v2457_v13 = vld [vmem:[#allocation32_spill] sm:$0xff] }
 0x3b7   :  { %1212 = vmatpush.msra.mxu1 %v2160_v9 }
 0x3b9   :  { %1213 = vmatpush.msra.mxu1 %v2167_v18 }
 0x3bb   :  { %1214 = vmatpush.msra.mxu1 %v2174_v37  ;;  %v2340_v37 = vld [vmem:[#allocation10 + $0x1] ss:$0 sm:$0xff] }
 0x3bc   :  { %v219_v57 = vadd.f32 %v2340_v37, %v2460_v36 }
 0x3bd   :  { %1215 = vmatpush.msra.mxu1 %v2181_v40  ;;  %v2458_v40 = vld [vmem:[#allocation43_spill] sm:$0xff] }
 0x3bf   :  { %1216 = vmatpush.msra.mxu1 %v2188_v43  ;;  %v216_v43 = vadd.f32 %v2340_v37, %v2458_v40 }
 0x3c1   :  { %1217 = vmatpush.msra.mxu1 %v2195_v45 }
 0x3c3   :  { %1218 = vmatpush.msra.mxu1 %v2202_v46 }
 0x3c5   :  { %1219 = vmatpush.msra.mxu1 %v2209_v47 }
 0x3c7   :  { %1220 = vmatpush.msra.mxu1 %v2216_v49 }
 0x3c9   :  { %1221 = vmatpush.msra.mxu1 %v2223_v50 }
 0x3cb   :  { %1222 = vmatpush.msra.mxu1 %v2230_v51 }
 0x3cd   :  { %1223 = vmatpush.msra.mxu1 %v2237_v52 }
 0x3cf   :  { %1224 = vmatpush.msra.mxu1 %v2244_v54 }
 0x3d1   :  { %1225 = vmatpush.msra.mxu1 %v2251_v55 }
 0x3d3   :  { %1226 = vmatpush.msra.mxu1 %v2258_v0 }
 0x431   :  { %v924_v41 = vpop.f32.mrf.mxu1 }
 0x432   :  { %v927_v9 = vadd.f32 %v924_v41, %v2457_v13 }
 0x434   :  { %v1296_v18 = vmul.f32 -1.442695, %v927_v9 }
 0x436   :  { %1368 = vpow2.f32 %v1296_v18 }
 0x437   :  { %v964_v45 = vpop.f32.mrf.mxu2 }
 0x438   :  { %v967_v46 = vadd.f32 %v964_v45, %v216_v43  ;;  %v1004_v34 = vpop.f32.mrf.mxu3 }
 0x439   :  { %v1005_v6 = vadd.f32 %v2347_v3, %v1004_v34 }
 0x43a   :  { %v1297_v47 = vmul.f32 -1.442695, %v967_v46 }
 0x43c   :  { %v1369_v49 = vpop.eup %1368  ;;  %1370 = vpow2.f32 %v1297_v47 }
 0x43d   :  { %v931_v50 = vadd.f32 1.0, %v1369_v49 }
 0x43f   :  { %1372 = vrcp.f32 %v931_v50  ;;  %v943_v63 = vand.u32 2147483648, %v931_v50  ;;  %v941_v31 = vand.u32 2147483647, %v931_v50  ;;  %vm937_vm10 = vweird.f32 %v931_v50 }
 0x441   :  { %v944_v35 = vor.u32 1.1754944e-38, %v943_v63  ;;  %vm942_vm12 = vcmp.eq.f32.partialorder %v941_v31, 8.507059e+37 }
 0x442   :  { %v1371_v51 = vpop.eup %1370 }
 0x443   :  { %v971_v52 = vadd.f32 1.0, %v1371_v51 }
 0x445   :  { %v1373_v54 = vpop.eup %1372  ;;  %1374 = vrcp.f32 %v971_v52  ;;  %v983_v48 = vand.u32 2147483648, %v971_v52  ;;  %v981_v30 = vand.u32 2147483647, %v971_v52  ;;  %vm977_vm14 = vweird.f32 %v971_v52 }
 0x446   :  { %v933_v55 = vmul.f32 %v1373_v54, %v931_v50  ;;  %vm938_vm9 = vweird.f32 %v1373_v54 }
 0x447   :  { %vm939_vm11 = vmor %vm937_vm10, %vm938_vm9  ;;  %v984_v4 = vor.u32 1.1754944e-38, %v983_v48  ;;  %vm982_vm0 = vcmp.eq.f32.partialorder %v981_v30, 8.507059e+37  ;;  %v2464_v30 = vld [vmem:[#allocation29_spill] sm:$0xff] }
 0x448   :  { %v934_v0 = vsub.f32 1.0, %v933_v55 }
 0x44a   :  { %v935_v29 = vmul.f32 %v1373_v54, %v934_v0 }
 0x44b   :  { %v1375_v33 = vpop.eup %1374 }
 0x44c   :  { %v973_v20 = vmul.f32 %v1375_v33, %v971_v52  ;;  %v936_v60 = vadd.f32 %v1373_v54, %v935_v29  ;;  %vm978_vm13 = vweird.f32 %v1375_v33 }
 0x44d   :  { %vm979_vm15 = vmor %vm977_vm14, %vm978_vm13 }
 0x44e   :  { %v974_v59 = vsub.f32 1.0, %v973_v20  ;;  %v940_v1 = vsel %vm939_vm11, %v1373_v54, %v936_v60  ;;  %v2462_v54 = vld [vmem:[#allocation44_spill] sm:$0xff] }
 0x44f   :  { %v945_v5 = vsel %vm942_vm12, %v944_v35, %v940_v1  ;;  %v276_v55 = vadd.f32 %v2350_v38, %v2462_v54 }
 0x450   :  { %v975_v56 = vmul.f32 %v1375_v33, %v974_v59  ;;  %v1007_v58 = vmul.f32 %v1005_v6, %v945_v5 }
 0x452   :  { %v976_v14 = vadd.f32 %v1375_v33, %v975_v56  ;;  %v1008_v53 = vadd.f32 %v1007_v58, %v273_v10  ;;  %v222_v10 = vadd.f32 %v2340_v37, %v2463_v7 }
 0x454   :  { %v980_v44 = vsel %vm979_vm15, %v1375_v33, %v976_v14  ;;  %1376 = vtanh.f32 %v1008_v53 }
 0x455   :  { %v985_v8 = vsel %vm982_vm0, %v984_v4, %v980_v44 }
 0x456   :  { %v1010_v16 = vsub.f32 1.0, %v985_v8  ;;  %v1012_v26 = vmul.f32 %v985_v8, %v2317_v28 }
 0x45a   :  { %v1377_v42 = vpop.eup %1376 }
 0x45b   :  { %v1011_v61 = vmul.f32 %v1377_v42, %v1010_v16 }
 0x45d   :  { %v1013_v12 = vadd.f32 %v1012_v26, %v1011_v61 }
 0x45f   :  { %1015 = vst [vmem:[#allocation12 + $0x28] sm:$0xff] %v1013_v12  ;;  %1035 = vmatmul.f32.vlgmr.msrb.gmra.mxu0 %v1013_v12  ;;  %1075 = vmatmul.f32.vlgmr.msrb.gmra.mxu1 %v1013_v12 }
 0x460   :  { %1115 = vmatmul.f32.vlgmr.msrb.gmra.mxu2 %v1013_v12 }
 0x4dc   :  { %v1036_v62 = vpop.f32.mrf.mxu0  ;;  %v1076_v11 = vpop.f32.mrf.mxu1 }
 0x4dd   :  { %v1039_v32 = vadd.f32 %v1036_v62, %v2461_v39  ;;  %v1079_v15 = vadd.f32 %v1076_v11, %v219_v57 }
 0x4df   :  { %v1298_v17 = vmul.f32 -1.442695, %v1039_v32  ;;  %v1299_v19 = vmul.f32 -1.442695, %v1079_v15 }
 0x4e1   :  { %1378 = vpow2.f32 %v1298_v17 }
 0x4e2   :  { %1380 = vpow2.f32 %v1299_v19 }
 0x4e3   :  { %v1116_v45 = vpop.f32.mrf.mxu2 }
 0x4e4   :  { %v1117_v50 = vadd.f32 %v2347_v3, %v1116_v45 }
 0x4e7   :  { %v1379_v21 = vpop.eup %1378 }
 0x4e8   :  { %v1381_v22 = vpop.eup %1380  ;;  %v1043_v23 = vadd.f32 1.0, %v1379_v21 }
 0x4e9   :  { %v1083_v2 = vadd.f32 1.0, %v1381_v22 }
 0x4ea   :  { %1382 = vrcp.f32 %v1043_v23  ;;  %v1055_v9 = vand.u32 2147483648, %v1043_v23  ;;  %v1053_v40 = vand.u32 2147483647, %v1043_v23  ;;  %vm1049_vm2 = vweird.f32 %v1043_v23 }
 0x4eb   :  { %1384 = vrcp.f32 %v1083_v2  ;;  %v1095_v0 = vand.u32 2147483648, %v1083_v2  ;;  %vm1089_vm6 = vweird.f32 %v1083_v2  ;;  %v1093_v29 = vand.u32 2147483647, %v1083_v2 }
 0x4ec   :  { %v1056_v47 = vor.u32 1.1754944e-38, %v1055_v9  ;;  %vm1054_vm4 = vcmp.eq.f32.partialorder %v1053_v40, 8.507059e+37 }
 0x4ed   :  { %v1096_v34 = vor.u32 1.1754944e-38, %v1095_v0  ;;  %vm1094_vm8 = vcmp.eq.f32.partialorder %v1093_v29, 8.507059e+37 }
 0x4f0   :  { %v1383_v24 = vpop.eup %1382 }
 0x4f1   :  { %v1385_v25 = vpop.eup %1384  ;;  %v1045_v27 = vmul.f32 %v1383_v24, %v1043_v23  ;;  %vm1050_vm1 = vweird.f32 %v1383_v24 }
 0x4f2   :  { %v1085_v28 = vmul.f32 %v1385_v25, %v1083_v2  ;;  %vm1051_vm3 = vmor %vm1049_vm2, %vm1050_vm1  ;;  %vm1090_vm5 = vweird.f32 %v1385_v25  ;;  %v2465_v2 = vld [vmem:[#allocation46_spill] sm:$0xff] }
 0x4f3   :  { %v1046_v41 = vsub.f32 1.0, %v1045_v27  ;;  %vm1091_vm7 = vmor %vm1089_vm6, %vm1090_vm5 }
 0x4f4   :  { %v1086_v13 = vsub.f32 1.0, %v1085_v28 }
 0x4f5   :  { %v1047_v18 = vmul.f32 %v1383_v24, %v1046_v41 }
 0x4f6   :  { %v1087_v43 = vmul.f32 %v1385_v25, %v1086_v13 }
 0x4f7   :  { %v1048_v46 = vadd.f32 %v1383_v24, %v1047_v18 }
 0x4f8   :  { %v1088_v51 = vadd.f32 %v1385_v25, %v1087_v43 }
 0x4f9   :  { %v1052_v49 = vsel %vm1051_vm3, %v1383_v24, %v1048_v46  ;;  %v279_v24 = vadd.f32 %v2350_v38, %v2465_v2 }
 0x4fa   :  { %v1057_v52 = vsel %vm1054_vm4, %v1056_v47, %v1052_v49  ;;  %v1092_v33 = vsel %vm1091_vm7, %v1385_v25, %v1088_v51 }
 0x4fb   :  { %v1119_v63 = vmul.f32 %v1117_v50, %v1057_v52  ;;  %v1097_v20 = vsel %vm1094_vm8, %v1096_v34, %v1092_v33 }
 0x4fc   :  { %v1122_v60 = vsub.f32 1.0, %v1097_v20  ;;  %v1124_v1 = vmul.f32 %v1097_v20, %v1013_v12 }
 0x4fd   :  { %v1120_v31 = vadd.f32 %v1119_v63, %v276_v55 }
 0x4ff   :  { %1386 = vtanh.f32 %v1120_v31 }
 0x505   :  { %v1387_v35 = vpop.eup %1386 }
 0x506   :  { %v1123_v59 = vmul.f32 %v1387_v35, %v1122_v60 }
 0x508   :  { %v1125_v6 = vadd.f32 %v1124_v1, %v1123_v59 }
 0x50a   :  { %1127 = vst [vmem:[#allocation12 + $0x30] sm:$0xff] %v1125_v6  ;;  %1147 = vmatmul.f32.vlgmr.msra.gmra.mxu3 %v1125_v6  ;;  %1187 = vmatmul.f32.vlgmr.msra.gmra.mxu0 %v1125_v6 }
 0x50b   :  { %1227 = vmatmul.f32.vlgmr.msra.gmra.mxu1 %v1125_v6 }
 0x587   :  { %v1188_v5 = vpop.f32.mrf.mxu0 }
 0x588   :  { %v1191_v56 = vadd.f32 %v1188_v5, %v222_v10  ;;  %v1228_v32 = vpop.f32.mrf.mxu1 }
 0x589   :  { %v1229_v19 = vadd.f32 %v2347_v3, %v1228_v32 }
 0x58a   :  { %v1301_v48 = vmul.f32 -1.442695, %v1191_v56 }
 0x58c   :  { %1388 = vpow2.f32 %v1301_v48 }
 0x58d   :  { %v1148_v58 = vpop.f32.mrf.mxu3 }
 0x58e   :  { %v1151_v14 = vadd.f32 %v1148_v58, %v2464_v30 }
 0x590   :  { %v1300_v53 = vmul.f32 -1.442695, %v1151_v14 }
 0x592   :  { %v1389_v4 = vpop.eup %1388  ;;  %1390 = vpow2.f32 %v1300_v53 }
 0x593   :  { %v1195_v44 = vadd.f32 1.0, %v1389_v4 }
 0x595   :  { %1392 = vrcp.f32 %v1195_v44  ;;  %v1207_v25 = vand.u32 2147483648, %v1195_v44  ;;  %vm1201_vm14 = vweird.f32 %v1195_v44  ;;  %v1205_v28 = vand.u32 2147483647, %v1195_v44 }
 0x597   :  { %v1208_v9 = vor.u32 1.1754944e-38, %v1207_v25  ;;  %vm1206_vm0 = vcmp.eq.f32.partialorder %v1205_v28, 8.507059e+37 }
 0x598   :  { %v1391_v8 = vpop.eup %1390 }
 0x599   :  { %v1155_v16 = vadd.f32 1.0, %v1391_v8 }
 0x59b   :  { %1394 = vrcp.f32 %v1155_v16  ;;  %v1393_v42 = vpop.eup %1392  ;;  %v1167_v57 = vand.u32 2147483648, %v1155_v16  ;;  %v1165_v11 = vand.u32 2147483647, %v1155_v16  ;;  %vm1161_vm10 = vweird.f32 %v1155_v16 }
 0x59c   :  { %v1197_v61 = vmul.f32 %v1393_v42, %v1195_v44  ;;  %vm1202_vm13 = vweird.f32 %v1393_v42 }
 0x59d   :  { %v1168_v17 = vor.u32 1.1754944e-38, %v1167_v57  ;;  %vm1166_vm12 = vcmp.eq.f32.partialorder %v1165_v11, 8.507059e+37  ;;  %vm1203_vm15 = vmor %vm1201_vm14, %vm1202_vm13 }
 0x59e   :  { %v1198_v37 = vsub.f32 1.0, %v1197_v61 }
 0x5a0   :  { %v1199_v39 = vmul.f32 %v1393_v42, %v1198_v37 }
 0x5a1   :  { %v1395_v26 = vpop.eup %1394 }
 0x5a2   :  { %v1157_v12 = vmul.f32 %v1395_v26, %v1155_v16  ;;  %vm1162_vm9 = vweird.f32 %v1395_v26  ;;  %v1200_v22 = vadd.f32 %v1393_v42, %v1199_v39 }
 0x5a3   :  { %vm1163_vm11 = vmor %vm1161_vm10, %vm1162_vm9 }
 0x5a4   :  { %v1158_v36 = vsub.f32 1.0, %v1157_v12  ;;  %v1204_v13 = vsel %vm1203_vm15, %v1393_v42, %v1200_v22 }
 0x5a5   :  { %v1209_v18 = vsel %vm1206_vm0, %v1208_v9, %v1204_v13 }
 0x5a6   :  { %v1159_v62 = vmul.f32 %v1395_v26, %v1158_v36  ;;  %v1234_v3 = vsub.f32 1.0, %v1209_v18  ;;  %v1236_v38 = vmul.f32 %v1209_v18, %v1125_v6 }
 0x5a8   :  { %v1160_v15 = vadd.f32 %v1395_v26, %v1159_v62 }
 0x5aa   :  { %v1164_v21 = vsel %vm1163_vm11, %v1395_v26, %v1160_v15 }
 0x5ab   :  { %v1169_v23 = vsel %vm1166_vm12, %v1168_v17, %v1164_v21 }
 0x5ac   :  { %v1231_v27 = vmul.f32 %v1229_v19, %v1169_v23 }
 0x5ae   :  { %v1232_v41 = vadd.f32 %v1231_v27, %v279_v24 }
 0x5b0   :  { %1396 = vtanh.f32 %v1232_v41 }
 0x5b6   :  { %v1397_v40 = vpop.eup %1396 }
 0x5b7   :  { %v1235_v43 = vmul.f32 %v1397_v40, %v1234_v3 }
 0x5b9   :  { %v1237_v45 = vadd.f32 %v1236_v38, %v1235_v43 }
 0x5bb   :  { %1239 = vst [vmem:[#allocation12 + $0x38] sm:$0xff] %v1237_v45 }
 0x5bc   :  { %1253 = dma.vmem_to_hbm [thread:$0]  %s1246_s17, 1024, %s1248_s20, [#allocation6], %s1578_s26, %s1578_s26, %s1579_s27  }
 0x5bd   :  { %1575 = dma.done.wait [#allocation6], 1024  }
 0x5be   :  { %1576 = vsyncadd [#allocation6], 4294966272 }
 0x5bf   :  { %1258 = vsyncpa [#allocation5], 1 }
 0x5c0   :  { %1259 = vsyncpa [#allocation8], 1 }
 0x5c1   :  { %1260 = vsyncpa [#allocation11], 1 }
 0x5c2   :  { %1261 = vsyncpa [#allocation6], 1 }

</bundles_post_ra>
